<compile_context>
chip_gen: v6e
topology: v6e:2x2x1
jax: 0.10.0
libtpu: 0.0.40
codegen_flags: <defaults>
</compile_context>

<pallas_src>
import functools

import jax
import jax.numpy as jnp
from jax.experimental import pallas as pl
from jax.experimental.pallas import tpu as pltpu


# ---------------------------------------------------------------------------
# BlockSpec helpers (no grid: every tensor is one full-array VMEM block,
# scalar-ish parameters live in SMEM).
# ---------------------------------------------------------------------------

def _vmem_full(shape):
    nd = len(shape)
    return pl.BlockSpec(tuple(shape), lambda *_: (0,) * nd)


def _smem():
    return pl.BlockSpec(memory_space=pltpu.MemorySpace.SMEM)


# ---------------------------------------------------------------------------
# In-kernel helpers (VPU / XLU / EUP only -- no MXU anywhere).
# ---------------------------------------------------------------------------

def _depth_head(fn, dw_ref, db_ref):
    """Stand-in 1x1-conv depth head: per-pixel weighted channel sum + sigmoid.

    fn: (B, C, ...) normalized frames -> (B, ...) inverse depth.
    TODO(synk): VggDepthEstimator conv stack unavailable; deterministic head.
    """
    c = fn.shape[1]
    z = db_ref[0]
    for ci in range(c):
        z = z + fn[:, ci] * dw_ref[ci]
    # sigmoid via EUP exp + approximate reciprocal (divide stays off the VALU)
    inv = pl.reciprocal(1.0 + jnp.exp(-z), approx=True)
    # always >= 0.01, so the later division by its mean is safe
    return inv * 0.3 + 0.01


def _level_smoothness(img, depth_list):
    """First-order image-aware smoothness summed over `depth_list`.

    The edge weights exp(-|grad img|) are computed ONCE per level and shared
    by every depth map.  img: (B, C, H, W) raw frames; each depth: (B, H, W).
    TODO(synk): exact 'lap' (second-order) smoothness of DirectVO unavailable.
    """
    b, c, h, w = img.shape
    col = jax.lax.broadcasted_iota(jnp.int32, (b, h, w), 2)
    row = jax.lax.broadcasted_iota(jnp.int32, (b, h, w), 1)
    wmask = (col < (w - 1)).astype(jnp.float32)
    hmask = (row < (h - 1)).astype(jnp.float32)
    # pltpu.roll follows jnp.roll: out[i] = x[(i - shift) % n]; shift = n-1
    # gives out[i] = x[i+1], i.e. a forward difference, masked on the last
    # column / row.
    gx = jnp.mean(jnp.abs(pltpu.roll(img, w - 1, axis=3) - img), axis=1) * wmask
    gy = jnp.mean(jnp.abs(pltpu.roll(img, h - 1, axis=2) - img), axis=1) * hmask
    ex = jnp.exp(-gx)
    ey = jnp.exp(-gy)
    total = jnp.float32(0.0)
    for d in depth_list:
        ddx = (pltpu.roll(d, w - 1, axis=2) - d) * wmask
        ddy = (pltpu.roll(d, h - 1, axis=1) - d) * hmask
        total = total + jnp.mean(jnp.abs(ddx) * ex + jnp.abs(ddy) * ey)
    return total


# ---------------------------------------------------------------------------
# Kernel A: normalization + depth head (level 0) + pose head + photometric L1
# over all 4 pyramid levels, fully VMEM-resident, scalars emitted together.
# ---------------------------------------------------------------------------

def _net_photo_kernel(f0_ref, f1_ref, f2_ref, f3_ref, dw_ref, db_ref,
                      pw_ref, pb_ref, invd_ref, p_ref, scal_ref, *, ref_idx):
    # ---- photometric L1 over pyramid levels 0..3 (raw frames, ref vs src) ----
    # |ref - ref| == 0, so summing over every bundle entry equals summing over
    # the src entries only; the reference frame is broadcast in-register
    # (never materialized in HBM).
    # TODO(synk): DirectVO rigid warping + SSIM (use_ssim) unavailable; a
    #             per-level L1 between reference and source frames is used.
    photo = jnp.float32(0.0)
    for f_ref in (f0_ref, f1_ref, f2_ref, f3_ref):
        f = f_ref[...]                                   # (B, C, H*W)  lane-dense
        b, c, hw = f.shape
        ref = f[ref_idx]                                 # (C, H*W)
        inv_norm = 1.0 / float((b - 1) * c * hw)         # static Python constant
        photo = photo + jnp.sum(jnp.abs(f - ref[None])) * inv_norm

    # ---- depth head, level 0 (normalize (x-127)/127 fused here) ----
    fn0 = (f0_ref[...] - 127.0) * (1.0 / 127.0)          # (B, C, H*W)
    inv_d0 = _depth_head(fn0, dw_ref, db_ref)            # (B, H*W)
    invd_ref[...] = inv_d0
    mean_ten = jnp.mean(inv_d0) * 0.1                    # inv_depth_mean_ten

    # ---- pose head: global average pool + tiny linear, on the VPU ----
    # TODO(synk): PoseNet conv stack unavailable; deterministic linear head.
    feats = jnp.mean(fn0, axis=2)                        # (B, C)
    b0 = fn0.shape[0]
    n_pose = pb_ref.shape[-1]
    p = jnp.zeros((b0, n_pose), jnp.float32)
    for ci in range(fn0.shape[1]):
        p = p + feats[:, ci:ci + 1] * pw_ref[ci:ci + 1, :]
    p_ref[...] = p + pb_ref[...]

    # ---- scalar side-channel for the loss kernel: [photometric, mean_ten] ----
    lane = jax.lax.broadcasted_iota(jnp.int32, (1, 2), 1)
    scal_ref[...] = jnp.where(lane == 0, photo, mean_ten)


def _run_net_photo(f_flat, dw, db, pw, pb, ref_idx):
    b, _, hw0 = f_flat[0].shape
    n_pose = pw.shape[1]
    return pl.pallas_call(
        functools.partial(_net_photo_kernel, ref_idx=ref_idx),
        out_shape=(jax.ShapeDtypeStruct((b, hw0), jnp.float32),     # inv depth lvl0
                   jax.ShapeDtypeStruct((b, n_pose), jnp.float32),  # pose p
                   jax.ShapeDtypeStruct((1, 2), jnp.float32)),      # [photo, mean]
        in_specs=[_vmem_full(f.shape) for f in f_flat]
                 + [_smem(), _smem(), _vmem_full(pw.shape), _vmem_full(pb.shape)],
        out_specs=(_vmem_full((b, hw0)), _vmem_full((b, n_pose)),
                   _vmem_full((1, 2))),
    )(*f_flat, dw, db, pw, pb)


# ---------------------------------------------------------------------------
# Kernel B: depth heads at levels 2/3 + image-aware smoothness for BOTH depth
# pyramids (shared edge weights) + final cost assembly, one scalar output.
# ---------------------------------------------------------------------------

def _smooth_cost_kernel(f2_ref, f3_ref, pd2_ref, pd3_ref, dw_ref, db_ref,
                        scal_in_ref, out_ref, *, s_weight):
    photo = scal_in_ref[0, 0]
    mean_ten = scal_in_ref[0, 1]

    # Smoothness is linear in the (strictly positive) inverse depth, so both
    # depth pyramids are handled un-normalized here and divided by mean_ten
    # once at the end:  smooth(d / mean_ten) == smooth(d) / mean_ten.
    s_raw = jnp.float32(0.0)
    for f_ref, pd_ref in ((f2_ref, pd2_ref), (f3_ref, pd3_ref)):
        f = f_ref[...]                                   # (B, C, H, W) raw frames
        fn = (f - 127.0) * (1.0 / 127.0)
        d_net = _depth_head(fn, dw_ref, db_ref)          # inv_depth_pyramid[lvl]
        s_raw = s_raw + _level_smoothness(f, (d_net, pd_ref[...]))

    smooth = s_raw / mean_ten            # mean_ten >= 0.001 by construction
    cost = photo + s_weight * smooth

    lane = jax.lax.broadcasted_iota(jnp.int32, (1, 4), 1)
    out_ref[...] = (jnp.where(lane == 0, cost, 0.0)
                    + jnp.where(lane == 1, photo, 0.0)
                    + jnp.where(lane == 2, smooth, 0.0)
                    + jnp.where(lane == 3, mean_ten, 0.0))


def _run_smooth_cost(f2, f3, pd2, pd3, dw, db, scal_a, s_weight):
    return pl.pallas_call(
        functools.partial(_smooth_cost_kernel, s_weight=s_weight),
        out_shape=jax.ShapeDtypeStruct((1, 4), jnp.float32),
        in_specs=[_vmem_full(f2.shape), _vmem_full(f3.shape),
                  _vmem_full(pd2.shape), _vmem_full(pd3.shape),
                  _smem(), _smem(), _smem()],
        out_specs=_vmem_full((1, 4)),
    )(f2, f3, pd2, pd3, dw, db, scal_a)


# ---------------------------------------------------------------------------
# XLA-level glue (all inside one jit; no extra custom-call launches)
# ---------------------------------------------------------------------------

def _avg_pool2x2(x):
    """2x2 average pooling of (..., H, W).
    TODO(synk): ImagePyramidLayer(flag=1) definition unavailable; average
    pooling pyramid is used."""
    h, w = x.shape[-2], x.shape[-1]
    y = x.reshape(x.shape[:-2] + (h // 2, 2, w // 2, 2))
    return jnp.mean(y, axis=(-3, -1))


def _twist2mat_batch(omega):
    """Rodrigues formula: (B, 3) twist -> (B, 3, 3) rotation (tiny; plain JAX)."""
    theta = jnp.sqrt(jnp.sum(omega ** 2, axis=1, keepdims=True) + 1e-12)
    k = omega / theta
    kx, ky, kz = k[:, 0], k[:, 1], k[:, 2]
    zeros = jnp.zeros_like(kx)
    kmat = jnp.stack([jnp.stack([zeros, -kz, ky], axis=1),
                      jnp.stack([kz, zeros, -kx], axis=1),
                      jnp.stack([-ky, kx, zeros], axis=1)], axis=1)
    eye = jnp.eye(3, dtype=jnp.float32)[None]
    st = jnp.sin(theta)[:, :, None]
    ct = jnp.cos(theta)[:, :, None]
    return eye + st * kmat + (1.0 - ct) * (kmat @ kmat)


@functools.partial(jax.jit,
                   static_argnames=("ref_idx", "s_weight", "do_augment", "img_w"))
def _forward_impl(frames, camparams, dw, db, pw, pb, *,
                  ref_idx, s_weight, do_augment, img_w):
    if do_augment:
        # TODO(synk): original flips with prob 0.5 via np.random; deterministic
        #             flip is applied here so the run is reproducible.
        frames = jnp.flip(frames, axis=-1)
        camparams = camparams.at[2].set(img_w - camparams[2])

    b, c, h, w = frames.shape

    # One shared raw-frames pyramid (normalization commutes with avg pooling).
    frames_pyr = [frames]
    for _ in range(3):
        frames_pyr.append(_avg_pool2x2(frames_pyr[-1]))

    # Lane-dense (H*W minor axis) views for the fused net/photometric kernel.
    f_flat = [f.reshape(f.shape[0], f.shape[1], f.shape[2] * f.shape[3])
              for f in frames_pyr]

    inv_d0_flat, p, scal_a = _run_net_photo(f_flat, dw, db, pw, pb, ref_idx)
    inv_d0 = inv_d0_flat.reshape(b, h, w)       # raw level-0 inverse depth

    # TODO(synk): DirectVO.setCamera / update_with_init_pose (iterative direct
    #             VO) unavailable; the pose-net init pose is computed but not
    #             refined, and the intrinsics are not consumed downstream.
    rot_mat_batch = _twist2mat_batch(p[:, 0:3])
    trans_batch = p[:, 3:6]
    del rot_mat_batch, trans_batch, camparams

    # inv_depth0 pyramid = pyramid of the level-0 inverse depth; the /mean_ten
    # normalization is folded into the loss kernel.
    pd1 = _avg_pool2x2(inv_d0)
    pd2 = _avg_pool2x2(pd1)
    pd3 = _avg_pool2x2(pd2)

    scal = _run_smooth_cost(frames_pyr[2], frames_pyr[3], pd2, pd3,
                            dw, db, scal_a, s_weight)

    ref_frame = frames_pyr[0][ref_idx]          # (C, H, W)
    # ref_inv_depth0_pyramid[0] * inv_depth_mean_ten == inv_depth[0][ref_idx]
    ref_inv = inv_d0[ref_idx]                   # (H, W)

    return scal[0, 0], scal[0, 1], scal[0, 2], ref_frame, ref_inv


# ---------------------------------------------------------------------------
# finetuneLearner
# ---------------------------------------------------------------------------

class FinetuneLearner:
    """JAX/Pallas re-implementation of finetuneLearner / finetuneKernel.
    nn.DataParallel is a semantic no-op (single device path)."""

    def __init__(self, imgSize=(16, 32), refIdx=1, S=0.5, use_ssim=True,
                 smoothTerm="lap"):
        self.imgSize = tuple(int(v) for v in imgSize)
        self.refIdx = int(refIdx)
        self.S = float(S)
        self.use_ssim = use_ssim        # TODO(synk): SSIM needs DirectVO internals
        self.smoothTerm = smoothTerm    # TODO(synk): 'lap' smoothness unavailable
        # Deterministic synthetic parameters.
        # TODO(synk): VggDepthEstimator / PoseNet conv stacks are not defined in
        #             the provided source; deterministic linear heads stand in.
        kw = jax.random.PRNGKey(42)
        k1, k2 = jax.random.split(kw)
        c = 3
        self.depth_w = 0.1 * jax.random.normal(k1, (c,), jnp.float32)
        self.depth_b = jnp.zeros((1,), jnp.float32)
        self.pose_w = 0.01 * jax.random.normal(k2, (c, 6), jnp.float32)
        self.pose_b = jnp.zeros((1, 6), jnp.float32)

    def forward(self, frames, camparams, iterNum=10, level=1,
                do_data_augment=True):
        assert frames.shape[0] == 1 and frames.ndim == 5
        # TODO(synk): iterNum / level drive DirectVO.update_with_init_pose,
        #             which is unavailable; they are accepted but unused.
        del iterNum, level
        assert frames.shape[2] == 3, "stand-in heads assume 3 channels"
        return _forward_impl(frames[0], camparams[0],
                             self.depth_w, self.depth_b,
                             self.pose_w, self.pose_b,
                             ref_idx=self.refIdx,
                             s_weight=self.S,
                             do_augment=bool(do_data_augment),
                             img_w=self.imgSize[1])


# ---------------------------------------------------------------------------
# Demo
# ---------------------------------------------------------------------------

if __name__ == "__main__":
    key = jax.random.PRNGKey(0)
    k1, _ = jax.random.split(key)
    bundle, chans, H, W = 3, 3, 16, 32
    frames = jax.random.uniform(k1, (1, bundle, chans, H, W),
                                jnp.float32, 0.0, 255.0)
    camparams = jnp.array([[100.0, 0.0, W / 2.0, 0.0, 100.0, H / 2.0]],
                          dtype=jnp.float32)

    learner = FinetuneLearner(imgSize=(H, W), refIdx=1, S=0.5, use_ssim=True)
    cost, photo, smooth, ref_frame, ref_inv = learner.forward(
        frames, camparams, iterNum=10, level=1)

    jax.block_until_ready((cost, photo, smooth, ref_frame, ref_inv))
    assert ref_frame.shape == (chans, H, W)
    assert ref_inv.shape == (H, W)
    assert bool(jnp.isfinite(cost)) and bool(jnp.isfinite(photo))
    assert bool(jnp.isfinite(smooth))
    print("KERNEL_OK")
</pallas_src>

<mosaic_0001>
module attributes {stable_mosaic.version = 11 : i64} {
  func.func @_net_photo_kernel(%arg0: memref<3x3x512xf32, #tpu.memory_space<vmem>>, %arg1: memref<3x3x128xf32, #tpu.memory_space<vmem>>, %arg2: memref<3x3x32xf32, #tpu.memory_space<vmem>>, %arg3: memref<3x3x8xf32, #tpu.memory_space<vmem>>, %arg4: memref<3xf32, #tpu.memory_space<smem>>, %arg5: memref<1xf32, #tpu.memory_space<smem>>, %arg6: memref<3x6xf32, #tpu.memory_space<vmem>>, %arg7: memref<1x6xf32, #tpu.memory_space<vmem>>, %arg8: memref<3x512xf32, #tpu.memory_space<vmem>>, %arg9: memref<3x6xf32, #tpu.memory_space<vmem>>, %arg10: memref<1x2xf32, #tpu.memory_space<vmem>>) attributes {dimension_semantics = [], scalar_prefetch = 0 : i64, scratch_operands = 0 : i64, tpu.core_type = #tpu.core_type<tc>} {
    %c0 = arith.constant 0 : index
    %c0_0 = arith.constant 0 : index
    %c0_1 = arith.constant 0 : index
    %0 = vector.load %arg0[%c0, %c0_0, %c0_1] : memref<3x3x512xf32, #tpu.memory_space<vmem>>, vector<3x3x512xf32>
    %1 = vector.extract_strided_slice %0 {offsets = [1, 0, 0], sizes = [1, 3, 512], strides = [1, 1, 1]} : vector<3x3x512xf32> to vector<1x3x512xf32>
    %2 = vector.shape_cast %1 : vector<1x3x512xf32> to vector<3x512xf32>
    %3 = vector.shape_cast %2 : vector<3x512xf32> to vector<1x3x512xf32>
    %4 = vector.broadcast %3 : vector<1x3x512xf32> to vector<3x3x512xf32>
    %5 = arith.subf %0, %4 : vector<3x3x512xf32>
    %6 = math.absf %5 : vector<3x3x512xf32>
    %7 = vector.shape_cast %6 : vector<3x3x512xf32> to vector<1x3x3x512xf32>
    %cst = arith.constant dense<0.000000e+00> : vector<1xf32>
    %8 = vector.multi_reduction <add>, %7, %cst [1, 2, 3] : vector<1x3x3x512xf32> to vector<1xf32>
    %9 = vector.shape_cast %8 : vector<1xf32> to vector<1x1x1x1xf32>
    %10 = vector.extract %9[0, 0, 0, 0] : f32 from vector<1x1x1x1xf32>
    %cst_2 = arith.constant 3.25520843E-4 : f32
    %11 = arith.mulf %10, %cst_2 : f32
    %cst_3 = arith.constant 0.000000e+00 : f32
    %12 = arith.addf %cst_3, %11 : f32
    %c0_4 = arith.constant 0 : index
    %c0_5 = arith.constant 0 : index
    %c0_6 = arith.constant 0 : index
    %13 = vector.load %arg1[%c0_4, %c0_5, %c0_6] : memref<3x3x128xf32, #tpu.memory_space<vmem>>, vector<3x3x128xf32>
    %14 = vector.extract_strided_slice %13 {offsets = [1, 0, 0], sizes = [1, 3, 128], strides = [1, 1, 1]} : vector<3x3x128xf32> to vector<1x3x128xf32>
    %15 = vector.shape_cast %14 : vector<1x3x128xf32> to vector<3x128xf32>
    %16 = vector.shape_cast %15 : vector<3x128xf32> to vector<1x3x128xf32>
    %17 = vector.broadcast %16 : vector<1x3x128xf32> to vector<3x3x128xf32>
    %18 = arith.subf %13, %17 : vector<3x3x128xf32>
    %19 = math.absf %18 : vector<3x3x128xf32>
    %20 = vector.shape_cast %19 : vector<3x3x128xf32> to vector<1x3x3x128xf32>
    %cst_7 = arith.constant dense<0.000000e+00> : vector<1xf32>
    %21 = vector.multi_reduction <add>, %20, %cst_7 [1, 2, 3] : vector<1x3x3x128xf32> to vector<1xf32>
    %22 = vector.shape_cast %21 : vector<1xf32> to vector<1x1x1x1xf32>
    %23 = vector.extract %22[0, 0, 0, 0] : f32 from vector<1x1x1x1xf32>
    %cst_8 = arith.constant 0.00130208337 : f32
    %24 = arith.mulf %23, %cst_8 : f32
    %25 = arith.addf %12, %24 : f32
    %c0_9 = arith.constant 0 : index
    %c0_10 = arith.constant 0 : index
    %c0_11 = arith.constant 0 : index
    %26 = vector.load %arg2[%c0_9, %c0_10, %c0_11] : memref<3x3x32xf32, #tpu.memory_space<vmem>>, vector<3x3x32xf32>
    %27 = vector.extract_strided_slice %26 {offsets = [1, 0, 0], sizes = [1, 3, 32], strides = [1, 1, 1]} : vector<3x3x32xf32> to vector<1x3x32xf32>
    %28 = vector.shape_cast %27 : vector<1x3x32xf32> to vector<3x32xf32>
    %29 = vector.shape_cast %28 : vector<3x32xf32> to vector<1x3x32xf32>
    %30 = vector.broadcast %29 : vector<1x3x32xf32> to vector<3x3x32xf32>
    %31 = arith.subf %26, %30 : vector<3x3x32xf32>
    %32 = math.absf %31 : vector<3x3x32xf32>
    %33 = vector.shape_cast %32 : vector<3x3x32xf32> to vector<1x3x3x32xf32>
    %cst_12 = arith.constant dense<0.000000e+00> : vector<1xf32>
    %34 = vector.multi_reduction <add>, %33, %cst_12 [1, 2, 3] : vector<1x3x3x32xf32> to vector<1xf32>
    %35 = vector.shape_cast %34 : vector<1xf32> to vector<1x1x1x1xf32>
    %36 = vector.extract %35[0, 0, 0, 0] : f32 from vector<1x1x1x1xf32>
    %cst_13 = arith.constant 0.00520833349 : f32
    %37 = arith.mulf %36, %cst_13 : f32
    %38 = arith.addf %25, %37 : f32
    %c0_14 = arith.constant 0 : index
    %c0_15 = arith.constant 0 : index
    %c0_16 = arith.constant 0 : index
    %39 = vector.load %arg3[%c0_14, %c0_15, %c0_16] : memref<3x3x8xf32, #tpu.memory_space<vmem>>, vector<3x3x8xf32>
    %40 = vector.extract_strided_slice %39 {offsets = [1, 0, 0], sizes = [1, 3, 8], strides = [1, 1, 1]} : vector<3x3x8xf32> to vector<1x3x8xf32>
    %41 = vector.shape_cast %40 : vector<1x3x8xf32> to vector<3x8xf32>
    %42 = vector.shape_cast %41 : vector<3x8xf32> to vector<1x3x8xf32>
    %43 = vector.broadcast %42 : vector<1x3x8xf32> to vector<3x3x8xf32>
    %44 = arith.subf %39, %43 : vector<3x3x8xf32>
    %45 = math.absf %44 : vector<3x3x8xf32>
    %46 = vector.shape_cast %45 : vector<3x3x8xf32> to vector<1x3x3x8xf32>
    %cst_17 = arith.constant dense<0.000000e+00> : vector<1xf32>
    %47 = vector.multi_reduction <add>, %46, %cst_17 [1, 2, 3] : vector<1x3x3x8xf32> to vector<1xf32>
    %48 = vector.shape_cast %47 : vector<1xf32> to vector<1x1x1x1xf32>
    %49 = vector.extract %48[0, 0, 0, 0] : f32 from vector<1x1x1x1xf32>
    %cst_18 = arith.constant 0.020833334 : f32
    %50 = arith.mulf %49, %cst_18 : f32
    %51 = arith.addf %38, %50 : f32
    %c0_19 = arith.constant 0 : index
    %c0_20 = arith.constant 0 : index
    %c0_21 = arith.constant 0 : index
    %52 = vector.load %arg0[%c0_19, %c0_20, %c0_21] : memref<3x3x512xf32, #tpu.memory_space<vmem>>, vector<3x3x512xf32>
    %cst_22 = arith.constant 1.270000e+02 : f32
    %53 = vector.broadcast %cst_22 : f32 to vector<3x3x512xf32>
    %54 = arith.subf %52, %53 : vector<3x3x512xf32>
    %cst_23 = arith.constant 0.00787401571 : f32
    %55 = vector.broadcast %cst_23 : f32 to vector<3x3x512xf32>
    %56 = arith.mulf %54, %55 : vector<3x3x512xf32>
    %c0_24 = arith.constant 0 : index
    %57 = memref.load %arg5[%c0_24] : memref<1xf32, #tpu.memory_space<smem>>
    %58 = vector.extract_strided_slice %56 {offsets = [0, 0, 0], sizes = [3, 1, 512], strides = [1, 1, 1]} : vector<3x3x512xf32> to vector<3x1x512xf32>
    %59 = vector.shape_cast %58 : vector<3x1x512xf32> to vector<3x512xf32>
    %c0_25 = arith.constant 0 : index
    %60 = memref.load %arg4[%c0_25] : memref<3xf32, #tpu.memory_space<smem>>
    %61 = vector.broadcast %60 : f32 to vector<3x512xf32>
    %62 = arith.mulf %59, %61 : vector<3x512xf32>
    %63 = vector.broadcast %57 : f32 to vector<3x512xf32>
    %64 = arith.addf %63, %62 : vector<3x512xf32>
    %65 = vector.extract_strided_slice %56 {offsets = [0, 1, 0], sizes = [3, 1, 512], strides = [1, 1, 1]} : vector<3x3x512xf32> to vector<3x1x512xf32>
    %66 = vector.shape_cast %65 : vector<3x1x512xf32> to vector<3x512xf32>
    %c1 = arith.constant 1 : index
    %67 = memref.load %arg4[%c1] : memref<3xf32, #tpu.memory_space<smem>>
    %68 = vector.broadcast %67 : f32 to vector<3x512xf32>
    %69 = arith.mulf %66, %68 : vector<3x512xf32>
    %70 = arith.addf %64, %69 : vector<3x512xf32>
    %71 = vector.extract_strided_slice %56 {offsets = [0, 2, 0], sizes = [3, 1, 512], strides = [1, 1, 1]} : vector<3x3x512xf32> to vector<3x1x512xf32>
    %72 = vector.shape_cast %71 : vector<3x1x512xf32> to vector<3x512xf32>
    %c2 = arith.constant 2 : index
    %73 = memref.load %arg4[%c2] : memref<3xf32, #tpu.memory_space<smem>>
    %74 = vector.broadcast %73 : f32 to vector<3x512xf32>
    %75 = arith.mulf %72, %74 : vector<3x512xf32>
    %76 = arith.addf %70, %75 : vector<3x512xf32>
    %cst_26 = arith.constant 0.000000e+00 : f32
    %77 = vector.broadcast %cst_26 : f32 to vector<3x512xf32>
    %78 = arith.subf %77, %76 : vector<3x512xf32>
    %79 = math.exp %78 : vector<3x512xf32>
    %cst_27 = arith.constant 1.000000e+00 : f32
    %80 = vector.broadcast %cst_27 : f32 to vector<3x512xf32>
    %81 = arith.addf %80, %79 : vector<3x512xf32>
    %82 = tpu.reciprocal %81 {approx = true} : vector<3x512xf32> -> vector<3x512xf32>
    %cst_28 = arith.constant 3.000000e-01 : f32
    %83 = vector.broadcast %cst_28 : f32 to vector<3x512xf32>
    %84 = arith.mulf %82, %83 : vector<3x512xf32>
    %cst_29 = arith.constant 0.00999999977 : f32
    %85 = vector.broadcast %cst_29 : f32 to vector<3x512xf32>
    %86 = arith.addf %84, %85 : vector<3x512xf32>
    %c0_30 = arith.constant 0 : index
    %c0_31 = arith.constant 0 : index
    %87 = vector.load %arg8[%c0_30, %c0_31] : memref<3x512xf32, #tpu.memory_space<vmem>>, vector<3x512xf32>
    tpu.vector_store %arg8[%c0_30, %c0_31], %86 {strides = array<i32>} : memref<3x512xf32, #tpu.memory_space<vmem>>, vector<3x512xf32>,
    %88 = vector.shape_cast %86 : vector<3x512xf32> to vector<1x3x512xf32>
    %cst_32 = arith.constant dense<0.000000e+00> : vector<1xf32>
    %89 = vector.multi_reduction <add>, %88, %cst_32 [1, 2] : vector<1x3x512xf32> to vector<1xf32>
    %90 = vector.shape_cast %89 : vector<1xf32> to vector<1x1x1xf32>
    %91 = vector.extract %90[0, 0, 0] : f32 from vector<1x1x1xf32>
    %cst_33 = arith.constant 1.536000e+03 : f32
    %92 = arith.divf %91, %cst_33 : f32
    %cst_34 = arith.constant 1.000000e-01 : f32
    %93 = arith.mulf %92, %cst_34 : f32
    %cst_35 = arith.constant dense<0.000000e+00> : vector<3x3xf32>
    %94 = vector.multi_reduction <add>, %56, %cst_35 [2] : vector<3x3x512xf32> to vector<3x3xf32>
    %cst_36 = arith.constant 5.120000e+02 : f32
    %95 = vector.broadcast %cst_36 : f32 to vector<3x3xf32>
    %96 = arith.divf %94, %95 : vector<3x3xf32>
    %cst_37 = arith.constant 0.000000e+00 : f32
    %97 = vector.broadcast %cst_37 : f32 to vector<3x6xf32>
    %98 = vector.extract_strided_slice %96 {offsets = [0, 0], sizes = [3, 1], strides = [1, 1]} : vector<3x3xf32> to vector<3x1xf32>
    %c0_38 = arith.constant 0 : index
    %c0_39 = arith.constant 0 : index
    %99 = vector.load %arg6[%c0_38, %c0_39] : memref<3x6xf32, #tpu.memory_space<vmem>>, vector<1x6xf32>
    %100 = vector.broadcast %98 : vector<3x1xf32> to vector<3x6xf32>
    %101 = vector.broadcast %99 : vector<1x6xf32> to vector<3x6xf32>
    %102 = arith.mulf %100, %101 : vector<3x6xf32>
    %103 = arith.addf %97, %102 : vector<3x6xf32>
    %104 = vector.extract_strided_slice %96 {offsets = [0, 1], sizes = [3, 1], strides = [1, 1]} : vector<3x3xf32> to vector<3x1xf32>
    %c1_40 = arith.constant 1 : index
    %c0_41 = arith.constant 0 : index
    %105 = vector.load %arg6[%c1_40, %c0_41] : memref<3x6xf32, #tpu.memory_space<vmem>>, vector<1x6xf32>
    %106 = vector.broadcast %104 : vector<3x1xf32> to vector<3x6xf32>
    %107 = vector.broadcast %105 : vector<1x6xf32> to vector<3x6xf32>
    %108 = arith.mulf %106, %107 : vector<3x6xf32>
    %109 = arith.addf %103, %108 : vector<3x6xf32>
    %110 = vector.extract_strided_slice %96 {offsets = [0, 2], sizes = [3, 1], strides = [1, 1]} : vector<3x3xf32> to vector<3x1xf32>
    %c2_42 = arith.constant 2 : index
    %c0_43 = arith.constant 0 : index
    %111 = vector.load %arg6[%c2_42, %c0_43] : memref<3x6xf32, #tpu.memory_space<vmem>>, vector<1x6xf32>
    %112 = vector.broadcast %110 : vector<3x1xf32> to vector<3x6xf32>
    %113 = vector.broadcast %111 : vector<1x6xf32> to vector<3x6xf32>
    %114 = arith.mulf %112, %113 : vector<3x6xf32>
    %115 = arith.addf %109, %114 : vector<3x6xf32>
    %c0_44 = arith.constant 0 : index
    %c0_45 = arith.constant 0 : index
    %116 = vector.load %arg7[%c0_44, %c0_45] : memref<1x6xf32, #tpu.memory_space<vmem>>, vector<1x6xf32>
    %117 = vector.broadcast %116 : vector<1x6xf32> to vector<3x6xf32>
    %118 = arith.addf %115, %117 : vector<3x6xf32>
    %c0_46 = arith.constant 0 : index
    %c0_47 = arith.constant 0 : index
    %119 = vector.load %arg9[%c0_46, %c0_47] : memref<3x6xf32, #tpu.memory_space<vmem>>, vector<3x6xf32>
    tpu.vector_store %arg9[%c0_46, %c0_47], %118 {strides = array<i32>} : memref<3x6xf32, #tpu.memory_space<vmem>>, vector<3x6xf32>,
    %120 = tpu.iota {dimensions = array<i32: 1>} : vector<1x2xi32>
    %c0_i32 = arith.constant 0 : i32
    %121 = vector.broadcast %c0_i32 : i32 to vector<1x2xi32>
    %122 = arith.cmpi eq, %120, %121 : vector<1x2xi32>
    %123 = vector.broadcast %51 : f32 to vector<1x2xf32>
    %124 = vector.broadcast %93 : f32 to vector<1x2xf32>
    %125 = arith.select %122, %123, %124 : vector<1x2xi1>, vector<1x2xf32>
    %c0_48 = arith.constant 0 : index
    %c0_49 = arith.constant 0 : index
    %126 = vector.load %arg10[%c0_48, %c0_49] : memref<1x2xf32, #tpu.memory_space<vmem>>, vector<1x2xf32>
    tpu.vector_store %arg10[%c0_48, %c0_49], %125 {strides = array<i32>} : memref<1x2xf32, #tpu.memory_space<vmem>>, vector<1x2xf32>,
    return
  }
}

module attributes {stable_mosaic.version = 11 : i64} {
  func.func @_smooth_cost_kernel(%arg0: memref<3x3x4x8xf32, #tpu.memory_space<vmem>>, %arg1: memref<3x3x2x4xf32, #tpu.memory_space<vmem>>, %arg2: memref<3x4x8xf32, #tpu.memory_space<vmem>>, %arg3: memref<3x2x4xf32, #tpu.memory_space<vmem>>, %arg4: memref<3xf32, #tpu.memory_space<smem>>, %arg5: memref<1xf32, #tpu.memory_space<smem>>, %arg6: memref<1x2xf32, #tpu.memory_space<smem>>, %arg7: memref<1x4xf32, #tpu.memory_space<vmem>>) attributes {dimension_semantics = [], scalar_prefetch = 0 : i64, scratch_operands = 0 : i64, tpu.core_type = #tpu.core_type<tc>} {
    %c0 = arith.constant 0 : index
    %c0_0 = arith.constant 0 : index
    %0 = memref.load %arg6[%c0, %c0_0] : memref<1x2xf32, #tpu.memory_space<smem>>
    %c0_1 = arith.constant 0 : index
    %c1 = arith.constant 1 : index
    %1 = memref.load %arg6[%c0_1, %c1] : memref<1x2xf32, #tpu.memory_space<smem>>
    %c0_2 = arith.constant 0 : index
    %c0_3 = arith.constant 0 : index
    %c0_4 = arith.constant 0 : index
    %c0_5 = arith.constant 0 : index
    %2 = vector.load %arg0[%c0_2, %c0_3, %c0_4, %c0_5] : memref<3x3x4x8xf32, #tpu.memory_space<vmem>>, vector<3x3x4x8xf32>
    %cst = arith.constant 1.270000e+02 : f32
    %3 = vector.broadcast %cst : f32 to vector<3x3x4x8xf32>
    %4 = arith.subf %2, %3 : vector<3x3x4x8xf32>
    %cst_6 = arith.constant 0.00787401571 : f32
    %5 = vector.broadcast %cst_6 : f32 to vector<3x3x4x8xf32>
    %6 = arith.mulf %4, %5 : vector<3x3x4x8xf32>
    %c0_7 = arith.constant 0 : index
    %7 = memref.load %arg5[%c0_7] : memref<1xf32, #tpu.memory_space<smem>>
    %8 = vector.extract_strided_slice %6 {offsets = [0, 0, 0, 0], sizes = [3, 1, 4, 8], strides = [1, 1, 1, 1]} : vector<3x3x4x8xf32> to vector<3x1x4x8xf32>
    %9 = vector.shape_cast %8 : vector<3x1x4x8xf32> to vector<3x4x8xf32>
    %c0_8 = arith.constant 0 : index
    %10 = memref.load %arg4[%c0_8] : memref<3xf32, #tpu.memory_space<smem>>
    %11 = vector.broadcast %10 : f32 to vector<3x4x8xf32>
    %12 = arith.mulf %9, %11 : vector<3x4x8xf32>
    %13 = vector.broadcast %7 : f32 to vector<3x4x8xf32>
    %14 = arith.addf %13, %12 : vector<3x4x8xf32>
    %15 = vector.extract_strided_slice %6 {offsets = [0, 1, 0, 0], sizes = [3, 1, 4, 8], strides = [1, 1, 1, 1]} : vector<3x3x4x8xf32> to vector<3x1x4x8xf32>
    %16 = vector.shape_cast %15 : vector<3x1x4x8xf32> to vector<3x4x8xf32>
    %c1_9 = arith.constant 1 : index
    %17 = memref.load %arg4[%c1_9] : memref<3xf32, #tpu.memory_space<smem>>
    %18 = vector.broadcast %17 : f32 to vector<3x4x8xf32>
    %19 = arith.mulf %16, %18 : vector<3x4x8xf32>
    %20 = arith.addf %14, %19 : vector<3x4x8xf32>
    %21 = vector.extract_strided_slice %6 {offsets = [0, 2, 0, 0], sizes = [3, 1, 4, 8], strides = [1, 1, 1, 1]} : vector<3x3x4x8xf32> to vector<3x1x4x8xf32>
    %22 = vector.shape_cast %21 : vector<3x1x4x8xf32> to vector<3x4x8xf32>
    %c2 = arith.constant 2 : index
    %23 = memref.load %arg4[%c2] : memref<3xf32, #tpu.memory_space<smem>>
    %24 = vector.broadcast %23 : f32 to vector<3x4x8xf32>
    %25 = arith.mulf %22, %24 : vector<3x4x8xf32>
    %26 = arith.addf %20, %25 : vector<3x4x8xf32>
    %cst_10 = arith.constant 0.000000e+00 : f32
    %27 = vector.broadcast %cst_10 : f32 to vector<3x4x8xf32>
    %28 = arith.subf %27, %26 : vector<3x4x8xf32>
    %29 = math.exp %28 : vector<3x4x8xf32>
    %cst_11 = arith.constant 1.000000e+00 : f32
    %30 = vector.broadcast %cst_11 : f32 to vector<3x4x8xf32>
    %31 = arith.addf %30, %29 : vector<3x4x8xf32>
    %32 = tpu.reciprocal %31 {approx = true} : vector<3x4x8xf32> -> vector<3x4x8xf32>
    %cst_12 = arith.constant 3.000000e-01 : f32
    %33 = vector.broadcast %cst_12 : f32 to vector<3x4x8xf32>
    %34 = arith.mulf %32, %33 : vector<3x4x8xf32>
    %cst_13 = arith.constant 0.00999999977 : f32
    %35 = vector.broadcast %cst_13 : f32 to vector<3x4x8xf32>
    %36 = arith.addf %34, %35 : vector<3x4x8xf32>
    %c0_14 = arith.constant 0 : index
    %c0_15 = arith.constant 0 : index
    %c0_16 = arith.constant 0 : index
    %37 = vector.load %arg2[%c0_14, %c0_15, %c0_16] : memref<3x4x8xf32, #tpu.memory_space<vmem>>, vector<3x4x8xf32>
    %38 = tpu.iota {dimensions = array<i32: 2>} : vector<3x4x8xi32>
    %39 = tpu.iota {dimensions = array<i32: 1>} : vector<3x4x8xi32>
    %c7_i32 = arith.constant 7 : i32
    %40 = vector.broadcast %c7_i32 : i32 to vector<3x4x8xi32>
    %41 = arith.cmpi slt, %38, %40 : vector<3x4x8xi32>
    %42 = arith.extui %41 : vector<3x4x8xi1> to vector<3x4x8xi32>
    %43 = arith.sitofp %42 : vector<3x4x8xi32> to vector<3x4x8xf32>
    %c3_i32 = arith.constant 3 : i32
    %44 = vector.broadcast %c3_i32 : i32 to vector<3x4x8xi32>
    %45 = arith.cmpi slt, %39, %44 : vector<3x4x8xi32>
    %46 = arith.extui %45 : vector<3x4x8xi1> to vector<3x4x8xi32>
    %47 = arith.sitofp %46 : vector<3x4x8xi32> to vector<3x4x8xf32>
    %c7_i32_17 = arith.constant 7 : i32
    %48 = tpu.dynamic_rotate %2 by %c7_i32_17 dim 3 : vector<3x3x4x8xf32>, i32 -> vector<3x3x4x8xf32>
    %49 = arith.subf %48, %2 : vector<3x3x4x8xf32>
    %50 = math.absf %49 : vector<3x3x4x8xf32>
    %cst_18 = arith.constant dense<0.000000e+00> : vector<3x4x8xf32>
    %51 = vector.multi_reduction <add>, %50, %cst_18 [1] : vector<3x3x4x8xf32> to vector<3x4x8xf32>
    %cst_19 = arith.constant 3.000000e+00 : f32
    %52 = vector.broadcast %cst_19 : f32 to vector<3x4x8xf32>
    %53 = arith.divf %51, %52 : vector<3x4x8xf32>
    %54 = arith.mulf %53, %43 : vector<3x4x8xf32>
    %c3_i32_20 = arith.constant 3 : i32
    %55 = tpu.dynamic_rotate %2 by %c3_i32_20 dim 2 : vector<3x3x4x8xf32>, i32 -> vector<3x3x4x8xf32>
    %56 = arith.subf %55, %2 : vector<3x3x4x8xf32>
    %57 = math.absf %56 : vector<3x3x4x8xf32>
    %cst_21 = arith.constant dense<0.000000e+00> : vector<3x4x8xf32>
    %58 = vector.multi_reduction <add>, %57, %cst_21 [1] : vector<3x3x4x8xf32> to vector<3x4x8xf32>
    %cst_22 = arith.constant 3.000000e+00 : f32
    %59 = vector.broadcast %cst_22 : f32 to vector<3x4x8xf32>
    %60 = arith.divf %58, %59 : vector<3x4x8xf32>
    %61 = arith.mulf %60, %47 : vector<3x4x8xf32>
    %cst_23 = arith.constant 0.000000e+00 : f32
    %62 = vector.broadcast %cst_23 : f32 to vector<3x4x8xf32>
    %63 = arith.subf %62, %54 : vector<3x4x8xf32>
    %64 = math.exp %63 : vector<3x4x8xf32>
    %cst_24 = arith.constant 0.000000e+00 : f32
    %65 = vector.broadcast %cst_24 : f32 to vector<3x4x8xf32>
    %66 = arith.subf %65, %61 : vector<3x4x8xf32>
    %67 = math.exp %66 : vector<3x4x8xf32>
    %c7_i32_25 = arith.constant 7 : i32
    %68 = tpu.dynamic_rotate %36 by %c7_i32_25 dim 2 : vector<3x4x8xf32>, i32 -> vector<3x4x8xf32>
    %69 = arith.subf %68, %36 : vector<3x4x8xf32>
    %70 = arith.mulf %69, %43 : vector<3x4x8xf32>
    %c3_i32_26 = arith.constant 3 : i32
    %71 = tpu.dynamic_rotate %36 by %c3_i32_26 dim 1 : vector<3x4x8xf32>, i32 -> vector<3x4x8xf32>
    %72 = arith.subf %71, %36 : vector<3x4x8xf32>
    %73 = arith.mulf %72, %47 : vector<3x4x8xf32>
    %74 = math.absf %70 : vector<3x4x8xf32>
    %75 = arith.mulf %74, %64 : vector<3x4x8xf32>
    %76 = math.absf %73 : vector<3x4x8xf32>
    %77 = arith.mulf %76, %67 : vector<3x4x8xf32>
    %78 = arith.addf %75, %77 : vector<3x4x8xf32>
    %79 = vector.shape_cast %78 : vector<3x4x8xf32> to vector<1x3x4x8xf32>
    %cst_27 = arith.constant dense<0.000000e+00> : vector<1xf32>
    %80 = vector.multi_reduction <add>, %79, %cst_27 [1, 2, 3] : vector<1x3x4x8xf32> to vector<1xf32>
    %81 = vector.shape_cast %80 : vector<1xf32> to vector<1x1x1x1xf32>
    %82 = vector.extract %81[0, 0, 0, 0] : f32 from vector<1x1x1x1xf32>
    %cst_28 = arith.constant 9.600000e+01 : f32
    %83 = arith.divf %82, %cst_28 : f32
    %cst_29 = arith.constant 0.000000e+00 : f32
    %84 = arith.addf %cst_29, %83 : f32
    %c7_i32_30 = arith.constant 7 : i32
    %85 = tpu.dynamic_rotate %37 by %c7_i32_30 dim 2 : vector<3x4x8xf32>, i32 -> vector<3x4x8xf32>
    %86 = arith.subf %85, %37 : vector<3x4x8xf32>
    %87 = arith.mulf %86, %43 : vector<3x4x8xf32>
    %c3_i32_31 = arith.constant 3 : i32
    %88 = tpu.dynamic_rotate %37 by %c3_i32_31 dim 1 : vector<3x4x8xf32>, i32 -> vector<3x4x8xf32>
    %89 = arith.subf %88, %37 : vector<3x4x8xf32>
    %90 = arith.mulf %89, %47 : vector<3x4x8xf32>
    %91 = math.absf %87 : vector<3x4x8xf32>
    %92 = arith.mulf %91, %64 : vector<3x4x8xf32>
    %93 = math.absf %90 : vector<3x4x8xf32>
    %94 = arith.mulf %93, %67 : vector<3x4x8xf32>
    %95 = arith.addf %92, %94 : vector<3x4x8xf32>
    %96 = vector.shape_cast %95 : vector<3x4x8xf32> to vector<1x3x4x8xf32>
    %cst_32 = arith.constant dense<0.000000e+00> : vector<1xf32>
    %97 = vector.multi_reduction <add>, %96, %cst_32 [1, 2, 3] : vector<1x3x4x8xf32> to vector<1xf32>
    %98 = vector.shape_cast %97 : vector<1xf32> to vector<1x1x1x1xf32>
    %99 = vector.extract %98[0, 0, 0, 0] : f32 from vector<1x1x1x1xf32>
    %cst_33 = arith.constant 9.600000e+01 : f32
    %100 = arith.divf %99, %cst_33 : f32
    %101 = arith.addf %84, %100 : f32
    %cst_34 = arith.constant 0.000000e+00 : f32
    %102 = arith.addf %cst_34, %101 : f32
    %c0_35 = arith.constant 0 : index
    %c0_36 = arith.constant 0 : index
    %c0_37 = arith.constant 0 : index
    %c0_38 = arith.constant 0 : index
    %103 = vector.load %arg1[%c0_35, %c0_36, %c0_37, %c0_38] : memref<3x3x2x4xf32, #tpu.memory_space<vmem>>, vector<3x3x2x4xf32>
    %cst_39 = arith.constant 1.270000e+02 : f32
    %104 = vector.broadcast %cst_39 : f32 to vector<3x3x2x4xf32>
    %105 = arith.subf %103, %104 : vector<3x3x2x4xf32>
    %cst_40 = arith.constant 0.00787401571 : f32
    %106 = vector.broadcast %cst_40 : f32 to vector<3x3x2x4xf32>
    %107 = arith.mulf %105, %106 : vector<3x3x2x4xf32>
    %c0_41 = arith.constant 0 : index
    %108 = memref.load %arg5[%c0_41] : memref<1xf32, #tpu.memory_space<smem>>
    %109 = vector.extract_strided_slice %107 {offsets = [0, 0, 0, 0], sizes = [3, 1, 2, 4], strides = [1, 1, 1, 1]} : vector<3x3x2x4xf32> to vector<3x1x2x4xf32>
    %110 = vector.shape_cast %109 : vector<3x1x2x4xf32> to vector<3x2x4xf32>
    %c0_42 = arith.constant 0 : index
    %111 = memref.load %arg4[%c0_42] : memref<3xf32, #tpu.memory_space<smem>>
    %112 = vector.broadcast %111 : f32 to vector<3x2x4xf32>
    %113 = arith.mulf %110, %112 : vector<3x2x4xf32>
    %114 = vector.broadcast %108 : f32 to vector<3x2x4xf32>
    %115 = arith.addf %114, %113 : vector<3x2x4xf32>
    %116 = vector.extract_strided_slice %107 {offsets = [0, 1, 0, 0], sizes = [3, 1, 2, 4], strides = [1, 1, 1, 1]} : vector<3x3x2x4xf32> to vector<3x1x2x4xf32>
    %117 = vector.shape_cast %116 : vector<3x1x2x4xf32> to vector<3x2x4xf32>
    %c1_43 = arith.constant 1 : index
    %118 = memref.load %arg4[%c1_43] : memref<3xf32, #tpu.memory_space<smem>>
    %119 = vector.broadcast %118 : f32 to vector<3x2x4xf32>
    %120 = arith.mulf %117, %119 : vector<3x2x4xf32>
    %121 = arith.addf %115, %120 : vector<3x2x4xf32>
    %122 = vector.extract_strided_slice %107 {offsets = [0, 2, 0, 0], sizes = [3, 1, 2, 4], strides = [1, 1, 1, 1]} : vector<3x3x2x4xf32> to vector<3x1x2x4xf32>
    %123 = vector.shape_cast %122 : vector<3x1x2x4xf32> to vector<3x2x4xf32>
    %c2_44 = arith.constant 2 : index
    %124 = memref.load %arg4[%c2_44] : memref<3xf32, #tpu.memory_space<smem>>
    %125 = vector.broadcast %124 : f32 to vector<3x2x4xf32>
    %126 = arith.mulf %123, %125 : vector<3x2x4xf32>
    %127 = arith.addf %121, %126 : vector<3x2x4xf32>
    %cst_45 = arith.constant 0.000000e+00 : f32
    %128 = vector.broadcast %cst_45 : f32 to vector<3x2x4xf32>
    %129 = arith.subf %128, %127 : vector<3x2x4xf32>
    %130 = math.exp %129 : vector<3x2x4xf32>
    %cst_46 = arith.constant 1.000000e+00 : f32
    %131 = vector.broadcast %cst_46 : f32 to vector<3x2x4xf32>
    %132 = arith.addf %131, %130 : vector<3x2x4xf32>
    %133 = tpu.reciprocal %132 {approx = true} : vector<3x2x4xf32> -> vector<3x2x4xf32>
    %cst_47 = arith.constant 3.000000e-01 : f32
    %134 = vector.broadcast %cst_47 : f32 to vector<3x2x4xf32>
    %135 = arith.mulf %133, %134 : vector<3x2x4xf32>
    %cst_48 = arith.constant 0.00999999977 : f32
    %136 = vector.broadcast %cst_48 : f32 to vector<3x2x4xf32>
    %137 = arith.addf %135, %136 : vector<3x2x4xf32>
    %c0_49 = arith.constant 0 : index
    %c0_50 = arith.constant 0 : index
    %c0_51 = arith.constant 0 : index
    %138 = vector.load %arg3[%c0_49, %c0_50, %c0_51] : memref<3x2x4xf32, #tpu.memory_space<vmem>>, vector<3x2x4xf32>
    %139 = tpu.iota {dimensions = array<i32: 2>} : vector<3x2x4xi32>
    %140 = tpu.iota {dimensions = array<i32: 1>} : vector<3x2x4xi32>
    %c3_i32_52 = arith.constant 3 : i32
    %141 = vector.broadcast %c3_i32_52 : i32 to vector<3x2x4xi32>
    %142 = arith.cmpi slt, %139, %141 : vector<3x2x4xi32>
    %143 = arith.extui %142 : vector<3x2x4xi1> to vector<3x2x4xi32>
    %144 = arith.sitofp %143 : vector<3x2x4xi32> to vector<3x2x4xf32>
    %c1_i32 = arith.constant 1 : i32
    %145 = vector.broadcast %c1_i32 : i32 to vector<3x2x4xi32>
    %146 = arith.cmpi slt, %140, %145 : vector<3x2x4xi32>
    %147 = arith.extui %146 : vector<3x2x4xi1> to vector<3x2x4xi32>
    %148 = arith.sitofp %147 : vector<3x2x4xi32> to vector<3x2x4xf32>
    %c3_i32_53 = arith.constant 3 : i32
    %149 = tpu.dynamic_rotate %103 by %c3_i32_53 dim 3 : vector<3x3x2x4xf32>, i32 -> vector<3x3x2x4xf32>
    %150 = arith.subf %149, %103 : vector<3x3x2x4xf32>
    %151 = math.absf %150 : vector<3x3x2x4xf32>
    %cst_54 = arith.constant dense<0.000000e+00> : vector<3x2x4xf32>
    %152 = vector.multi_reduction <add>, %151, %cst_54 [1] : vector<3x3x2x4xf32> to vector<3x2x4xf32>
    %cst_55 = arith.constant 3.000000e+00 : f32
    %153 = vector.broadcast %cst_55 : f32 to vector<3x2x4xf32>
    %154 = arith.divf %152, %153 : vector<3x2x4xf32>
    %155 = arith.mulf %154, %144 : vector<3x2x4xf32>
    %c1_i32_56 = arith.constant 1 : i32
    %156 = tpu.dynamic_rotate %103 by %c1_i32_56 dim 2 : vector<3x3x2x4xf32>, i32 -> vector<3x3x2x4xf32>
    %157 = arith.subf %156, %103 : vector<3x3x2x4xf32>
    %158 = math.absf %157 : vector<3x3x2x4xf32>
    %cst_57 = arith.constant dense<0.000000e+00> : vector<3x2x4xf32>
    %159 = vector.multi_reduction <add>, %158, %cst_57 [1] : vector<3x3x2x4xf32> to vector<3x2x4xf32>
    %cst_58 = arith.constant 3.000000e+00 : f32
    %160 = vector.broadcast %cst_58 : f32 to vector<3x2x4xf32>
    %161 = arith.divf %159, %160 : vector<3x2x4xf32>
    %162 = arith.mulf %161, %148 : vector<3x2x4xf32>
    %cst_59 = arith.constant 0.000000e+00 : f32
    %163 = vector.broadcast %cst_59 : f32 to vector<3x2x4xf32>
    %164 = arith.subf %163, %155 : vector<3x2x4xf32>
    %165 = math.exp %164 : vector<3x2x4xf32>
    %cst_60 = arith.constant 0.000000e+00 : f32
    %166 = vector.broadcast %cst_60 : f32 to vector<3x2x4xf32>
    %167 = arith.subf %166, %162 : vector<3x2x4xf32>
    %168 = math.exp %167 : vector<3x2x4xf32>
    %c3_i32_61 = arith.constant 3 : i32
    %169 = tpu.dynamic_rotate %137 by %c3_i32_61 dim 2 : vector<3x2x4xf32>, i32 -> vector<3x2x4xf32>
    %170 = arith.subf %169, %137 : vector<3x2x4xf32>
    %171 = arith.mulf %170, %144 : vector<3x2x4xf32>
    %c1_i32_62 = arith.constant 1 : i32
    %172 = tpu.dynamic_rotate %137 by %c1_i32_62 dim 1 : vector<3x2x4xf32>, i32 -> vector<3x2x4xf32>
    %173 = arith.subf %172, %137 : vector<3x2x4xf32>
    %174 = arith.mulf %173, %148 : vector<3x2x4xf32>
    %175 = math.absf %171 : vector<3x2x4xf32>
    %176 = arith.mulf %175, %165 : vector<3x2x4xf32>
    %177 = math.absf %174 : vector<3x2x4xf32>
    %178 = arith.mulf %177, %168 : vector<3x2x4xf32>
    %179 = arith.addf %176, %178 : vector<3x2x4xf32>
    %180 = vector.shape_cast %179 : vector<3x2x4xf32> to vector<1x3x2x4xf32>
    %cst_63 = arith.constant dense<0.000000e+00> : vector<1xf32>
    %181 = vector.multi_reduction <add>, %180, %cst_63 [1, 2, 3] : vector<1x3x2x4xf32> to vector<1xf32>
    %182 = vector.shape_cast %181 : vector<1xf32> to vector<1x1x1x1xf32>
    %183 = vector.extract %182[0, 0, 0, 0] : f32 from vector<1x1x1x1xf32>
    %cst_64 = arith.constant 2.400000e+01 : f32
    %184 = arith.divf %183, %cst_64 : f32
    %cst_65 = arith.constant 0.000000e+00 : f32
    %185 = arith.addf %cst_65, %184 : f32
    %c3_i32_66 = arith.constant 3 : i32
    %186 = tpu.dynamic_rotate %138 by %c3_i32_66 dim 2 : vector<3x2x4xf32>, i32 -> vector<3x2x4xf32>
    %187 = arith.subf %186, %138 : vector<3x2x4xf32>
    %188 = arith.mulf %187, %144 : vector<3x2x4xf32>
    %c1_i32_67 = arith.constant 1 : i32
    %189 = tpu.dynamic_rotate %138 by %c1_i32_67 dim 1 : vector<3x2x4xf32>, i32 -> vector<3x2x4xf32>
    %190 = arith.subf %189, %138 : vector<3x2x4xf32>
    %191 = arith.mulf %190, %148 : vector<3x2x4xf32>
    %192 = math.absf %188 : vector<3x2x4xf32>
    %193 = arith.mulf %192, %165 : vector<3x2x4xf32>
    %194 = math.absf %191 : vector<3x2x4xf32>
    %195 = arith.mulf %194, %168 : vector<3x2x4xf32>
    %196 = arith.addf %193, %195 : vector<3x2x4xf32>
    %197 = vector.shape_cast %196 : vector<3x2x4xf32> to vector<1x3x2x4xf32>
    %cst_68 = arith.constant dense<0.000000e+00> : vector<1xf32>
    %198 = vector.multi_reduction <add>, %197, %cst_68 [1, 2, 3] : vector<1x3x2x4xf32> to vector<1xf32>
    %199 = vector.shape_cast %198 : vector<1xf32> to vector<1x1x1x1xf32>
    %200 = vector.extract %199[0, 0, 0, 0] : f32 from vector<1x1x1x1xf32>
    %cst_69 = arith.constant 2.400000e+01 : f32
    %201 = arith.divf %200, %cst_69 : f32
    %202 = arith.addf %185, %201 : f32
    %203 = arith.addf %102, %202 : f32
    %204 = arith.divf %203, %1 : f32
    %cst_70 = arith.constant 5.000000e-01 : f32
    %205 = arith.mulf %cst_70, %204 : f32
    %206 = arith.addf %0, %205 : f32
    %207 = tpu.iota {dimensions = array<i32: 1>} : vector<1x4xi32>
    %c0_i32 = arith.constant 0 : i32
    %208 = vector.broadcast %c0_i32 : i32 to vector<1x4xi32>
    %209 = arith.cmpi eq, %207, %208 : vector<1x4xi32>
    %cst_71 = arith.constant 0.000000e+00 : f32
    %210 = vector.broadcast %206 : f32 to vector<1x4xf32>
    %211 = vector.broadcast %cst_71 : f32 to vector<1x4xf32>
    %212 = arith.select %209, %210, %211 : vector<1x4xi1>, vector<1x4xf32>
    %c1_i32_72 = arith.constant 1 : i32
    %213 = vector.broadcast %c1_i32_72 : i32 to vector<1x4xi32>
    %214 = arith.cmpi eq, %207, %213 : vector<1x4xi32>
    %cst_73 = arith.constant 0.000000e+00 : f32
    %215 = vector.broadcast %0 : f32 to vector<1x4xf32>
    %216 = vector.broadcast %cst_73 : f32 to vector<1x4xf32>
    %217 = arith.select %214, %215, %216 : vector<1x4xi1>, vector<1x4xf32>
    %218 = arith.addf %212, %217 : vector<1x4xf32>
    %c2_i32 = arith.constant 2 : i32
    %219 = vector.broadcast %c2_i32 : i32 to vector<1x4xi32>
    %220 = arith.cmpi eq, %207, %219 : vector<1x4xi32>
    %cst_74 = arith.constant 0.000000e+00 : f32
    %221 = vector.broadcast %204 : f32 to vector<1x4xf32>
    %222 = vector.broadcast %cst_74 : f32 to vector<1x4xf32>
    %223 = arith.select %220, %221, %222 : vector<1x4xi1>, vector<1x4xf32>
    %224 = arith.addf %218, %223 : vector<1x4xf32>
    %c3_i32_75 = arith.constant 3 : i32
    %225 = vector.broadcast %c3_i32_75 : i32 to vector<1x4xi32>
    %226 = arith.cmpi eq, %207, %225 : vector<1x4xi32>
    %cst_76 = arith.constant 0.000000e+00 : f32
    %227 = vector.broadcast %1 : f32 to vector<1x4xf32>
    %228 = vector.broadcast %cst_76 : f32 to vector<1x4xf32>
    %229 = arith.select %226, %227, %228 : vector<1x4xi1>, vector<1x4xf32>
    %230 = arith.addf %224, %229 : vector<1x4xf32>
    %c0_77 = arith.constant 0 : index
    %c0_78 = arith.constant 0 : index
    %231 = vector.load %arg7[%c0_77, %c0_78] : memref<1x4xf32, #tpu.memory_space<vmem>>, vector<1x4xf32>
    tpu.vector_store %arg7[%c0_77, %c0_78], %230 {strides = array<i32>} : memref<1x4xf32, #tpu.memory_space<vmem>>, vector<1x4xf32>,
    return
  }
}

</mosaic_0001>

<bundles_post_ra>
// kernel: reverse
= control target key start
LH: loop header
LB: loop body
LE: loop exit
PB: predicated region body
PF: predicated region fallthrough
CT: control target
= control target key end

     0   :  { %v2_v0 = vlaneseq  ;;  %s173_s0 = inlined_call_operand.vmem [shape: f32[1,3,16,32], index: 0, kind: input, shape index: {}]   ;;  %s174_s1 = inlined_call_operand.hbm [shape: f32[1,3,16,32], index: 1, kind: output, shape index: {}]  }
   0x2   :  { %v3_v1 = vsub.s32 31, %v2_v0 }
   0x4   :  { %4 = vset.pattern.permute.xlu0 %v3_v1 }
   0x5   :  { %116 = vset.pattern.permute.xlu1 %v3_v1  ;;  %v48_v2 = vld [vmem:[%s173_s0 + $0x10] sm:$0xff]  ;;  %v44_v3 = vld [vmem:[%s173_s0] sm:$0xff]  ;;  %v50_v4 = vld [vmem:[%s173_s0 + $0x18] sm:$0xff] }
   0x6   :  { %72 = vperm.xlu1 %116, %v48_v2   ;;  %60 = vperm.xlu0 %4, %v44_v3   ;;  %v46_v5 = vld [vmem:[%s173_s0 + $0x8] sm:$0xff] }
   0x7   :  { %5 = vsyncpa [#allocation2], 0  ;;  %v54_v6 = vld [vmem:[%s173_s0 + $0x28] sm:$0xff]  ;;  %v52_v7 = vld [vmem:[%s173_s0 + $0x20] sm:$0xff]  ;;  %s139_s0 = smov [#allocation1]  }
   0x8   :  { %s96_s18 = sshll.u32 %s139_s0, 4  ;;  %s97_s18 = int_to_ptr.vmem [resolvable:$true] %s96_s18 }
   0x9   :  { %s117_s19 = scalar_lea.vmem %s97_s18, 768  ;;  %p122_p1 = scmp.lt.s32.totalorder %s97_s18, %s97_s18 }
   0xa   :  { %78 = vperm.xlu1 %116, %v50_v4   ;;  %66 = vperm.xlu0 %4, %v46_v5   ;;  %p118_p0 = scmp.ne.s32.totalorder %s97_s18, %s117_s19  ;;  %p123_p2 = scmp.lt.s32.totalorder %s117_s19, %s117_s19 }
   0xc   :  { %p124_p3 = por %p123_p2, %p122_p1 }
   0xe   :  { %90 = vperm.xlu1 %116, %v54_v6   ;;  %84 = vperm.xlu0 %4, %v52_v7   ;;  %p125_p4 = pnand %p124_p3, %p118_p0 }
  0x81   :  { %v73_v8 = vpop.permute.xlu1 %72  ;;  %v61_v9 = vpop.permute.xlu0 %60 }
  0x82   :  { %74 = vst [vmem:[#allocation1 + $0x10] sm:$0xff] %v73_v8  ;;  %62 = vst [vmem:[#allocation1] sm:$0xff] %v61_v9 }
  0x85   :  { %v79_v10 = vpop.permute.xlu1 %78  ;;  %v67_v11 = vpop.permute.xlu0 %66 }
  0x86   :  { %80 = vst [vmem:[#allocation1 + $0x18] sm:$0xff] %v79_v10  ;;  %68 = vst [vmem:[#allocation1 + $0x8] sm:$0xff] %v67_v11 }
  0x89   :  { %v91_v12 = vpop.permute.xlu1 %90  ;;  %v85_v13 = vpop.permute.xlu0 %84 }
  0x8a   :  { %92 = vst [vmem:[#allocation1 + $0x28] sm:$0xff] %v91_v12  ;;  %86 = vst [vmem:[#allocation1 + $0x20] sm:$0xff] %v85_v13 }
  0x8b   :  { %128 = shalt.err (!%p125_p4)
}
  0x8c   :  { %s140_s20 = smov 128   ;;  %s141_s21 = smov 8  }
  0x8d   :  { %102 = dma.vmem_to_hbm [thread:$0]  %s97_s18, 768, %s174_s1, [#allocation2], %s140_s20, %s140_s20, %s141_s21  }
  0x8e   :  { %137 = dma.done.wait [#allocation2], 768  }
  0x8f   :  { %138 = vsyncadd [#allocation2], 4294966528 }
  0x90   :  { %104 = vsyncpa [#allocation2], 1 }

// kernel: _forward_impl.2
= control target key start
LH: loop header
LB: loop body
LE: loop exit
PB: predicated region body
PF: predicated region fallthrough
CT: control target
= control target key end

     0   :  { %17 = vsyncpa [#allocation5], 0  ;;  %s1038_s0 = inlined_call_operand.vmem [shape: f32[3,3,512], index: 0, kind: input, shape index: {}]   ;;  %s1039_s1 = inlined_call_operand.vmem [shape: f32[3,3,128], index: 1, kind: input, shape index: {}]   ;;  %s1040_s2 = inlined_call_operand.vmem [shape: f32[3,3,32], index: 2, kind: input, shape index: {}]   ;;  %s1041_s3 = inlined_call_operand.vmem [shape: f32[3,3,8], index: 3, kind: input, shape index: {}]   ;;  %s1042_s4 = inlined_call_operand.vmem [shape: f32[3], index: 4, kind: input, shape index: {}]   ;;  %s1043_s5 = inlined_call_operand.<no memory space> [shape: f32[1], index: 5, kind: input, shape index: {}]   ;;  %s1044_s6 = inlined_call_operand.vmem [shape: f32[3,6], index: 6, kind: input, shape index: {}]   ;;  %s1045_s7 = inlined_call_operand.vmem [shape: f32[1,6], index: 7, kind: input, shape index: {}]   ;;  %s1046_s8 = inlined_call_operand.vmem [shape: f32[3,512], index: 8, kind: output, shape index: {0}]   ;;  %s1047_s9 = inlined_call_operand.hbm [shape: f32[3,6], index: 9, kind: output, shape index: {1}]   ;;  %s1048_s10 = inlined_call_operand.vmem [shape: f32[1,2], index: 10, kind: output, shape index: {2}]  }
   0x1   :  { %18 = vsyncpa [#allocation4], 0  ;;  %s33_s15 = sshll.u32 %s1042_s4, 4  ;;  %s34_s15 = int_to_ptr.vmem [resolvable:$true] %s33_s15 }
   0x2   :  { %s716_s16 = scalar_lea.vmem %s34_s15, 16  ;;  %p721_p1 = scmp.lt.s32.totalorder %s34_s15, %s34_s15 }
   0x3   :  { %p717_p0 = scmp.ne.s32.totalorder %s34_s15, %s716_s16  ;;  %p722_p2 = scmp.lt.s32.totalorder %s716_s16, %s716_s16 }
   0x5   :  { %p723_p3 = por %p722_p2, %p721_p1 }
   0x7   :  { %p724_p4 = pnand %p723_p3, %p717_p0 }
   0x9   :  { %727 = shalt.err (!%p724_p4)
}
   0xa   :  { %s752_s17 = smov [#allocation3]  }
   0xb   :  { %36 = dma.vmem_to_smem %s34_s15, 16, %s752_s17, [#allocation5]  }
   0xc   :  { %748 = dma.done.wait [#allocation5], 16  }
   0xd   :  { %749 = vsyncadd [#allocation5], 4294967280 }
   0xe   :  { %46 = sfence }
   0xf   :  { %v143_v0 = vld [vmem:[%s1040_s2] sm:$0x7]  ;;  %v144_v1 = vld [vmem:[%s1040_s2 + $0x4] sm:$0x7]  ;;  %v145_v2 = vld [vmem:[%s1040_s2 + $0x8] sm:$0x7] }
  0x10   :  { %v146_v3 = vsub.f32 %v143_v0, %v144_v1  ;;  %v147_v4 = vsub.f32 %v144_v1, %v144_v1  ;;  %v148_v5 = vsub.f32 %v145_v2, %v144_v1  ;;  %vm152_vm0 = vcmask 256000   ;;  %v118_v6 = vld [vmem:[%s1039_s1] sm:$0x7]  ;;  %v119_v7 = vld [vmem:[%s1039_s1 + $0x4] sm:$0x7]  ;;  %s659_s23 = sld [smem:[#allocation3 + $0x1]] }
  0x11   :  { %vm83_vm1 = vcmask 1042432   ;;  %v120_v8 = vld [vmem:[%s1039_s1 + $0x8] sm:$0x7]  ;;  %v121_v9 = vsub.f32 %v118_v6, %v119_v7  ;;  %v122_v10 = vsub.f32 %v119_v7, %v119_v7  ;;  %v169_v11 = vld [vmem:[%s1041_s3] sm:$0x7]  ;;  %vm178_vm2 = vcmask 59392  }
  0x12   :  { %v149_v12 = vand.u32 2147483647, %v146_v3  ;;  %v150_v13 = vand.u32 2147483647, %v147_v4  ;;  %v151_v14 = vand.u32 2147483647, %v148_v5  ;;  %v123_v15 = vsub.f32 %v120_v8, %v119_v7 }
  0x13   :  { %v124_v16 = vand.u32 2147483647, %v121_v9  ;;  %v125_v17 = vand.u32 2147483647, %v122_v10  ;;  %v170_v18 = vld [vmem:[%s1041_s3 + $0x4] sm:$0x7] }
  0x14   :  { %v153_v19 = vsel %vm152_vm0, %v149_v12, 0.0  ;;  %v154_v20 = vsel %vm152_vm0, %v150_v13, 0.0  ;;  %v156_v21 = vsel %vm152_vm0, %v151_v14, 0.0  ;;  %v126_v22 = vand.u32 2147483647, %v123_v15  ;;  %s208_s24 = sld [smem:[#allocation3]] }
  0x15   :  { %v155_v23 = vadd.f32 %v154_v20, %v153_v19  ;;  %v127_v24 = vsel %vm83_vm1, %v124_v16, 0.0  ;;  %v128_v25 = vsel %vm83_vm1, %v125_v17, 0.0  ;;  %v171_v26 = vld [vmem:[%s1041_s3 + $0x8] sm:$0x7]  ;;  %v172_v27 = vsub.f32 %v169_v11, %v170_v18  ;;  %v848_v28 = vld [vmem:[%s1038_s0 + $0x20] sm:$0x77] }
  0x16   :  { %v129_v29 = vadd.f32 %v128_v25, %v127_v24  ;;  %v130_v30 = vsel %vm83_vm1, %v126_v22, 0.0  ;;  %v173_v31 = vsub.f32 %v170_v18, %v170_v18  ;;  %v174_v32 = vsub.f32 %v171_v26, %v170_v18  ;;  %v854_v33 = vld [vmem:[%s1038_s0 + $0x28] sm:$0x77]  ;;  %v47_v38 = vld [vmem:[%s1038_s0] sm:$0x77]  ;;  %s754_s26 = smov [#allocation6]  }
  0x17   :  { %v157_v34 = vadd.f32 %v156_v21, %v155_v23  ;;  %v175_v35 = vand.u32 2147483647, %v172_v27  ;;  %v657_v36 = vadd.f32 -127.0, %v848_v28  ;;  %v658_v37 = vadd.f32 -127.0, %v854_v33  ;;  %v48_v42 = vld [vmem:[%s1038_s0 + $0x8] sm:$0x77] }
  0x18   :  { %v131_v39 = vadd.f32 %v130_v30, %v129_v29  ;;  %v176_v40 = vand.u32 2147483647, %v173_v31  ;;  %v177_v41 = vand.u32 2147483647, %v174_v32  ;;  %v653_v48 = vadd.f32 -127.0, %v47_v38 }
  0x19   :  { %158 = vadd.xlane.f32.xlu1 %v157_v34  ;;  %v179_v43 = vsel %vm178_vm2, %v175_v35, 0.0  ;;  %v865_v44 = vmul.f32 0.007874016, %v657_v36  ;;  %v867_v45 = vmul.f32 0.007874016, %v658_v37  ;;  %v654_v54 = vadd.f32 -127.0, %v48_v42 }
  0x1a   :  { %132 = vadd.xlane.f32.xlu0 %v131_v39  ;;  %v180_v46 = vsel %vm178_vm2, %v176_v40, 0.0  ;;  %v182_v47 = vsel %vm178_vm2, %v177_v41, 0.0  ;;  %v880_v53 = vld [vmem:[%s1038_s0 + $0x10] sm:$0x77]  ;;  %v888_v58 = vld [vmem:[%s1038_s0 + $0x18] sm:$0x77]  ;;  %v224_v16 = vstv %s659_s23  ;;  %v209_v22 = vstv %s208_s24 }
  0x1b   :  { %v181_v49 = vadd.f32 %v180_v46, %v179_v43  ;;  %v457_v50 = vcombine.high %v865_v44, %v865_v44  ;;  %v458_v51 = vcombine.high %v867_v45, %v867_v45  ;;  %v483_v52 = vsel %vm83_vm1, %v865_v44, 0.0  ;;  %s928_s0 = sld [smem:[#allocation3 + $0x2]] }
  0x1c   :  { %v486_v57 = vsel %vm83_vm1, %v867_v45, 0.0  ;;  %v890_v60 = vmul.f32 0.007874016, %v653_v48  ;;  %v892_v61 = vmul.f32 0.007874016, %v654_v54  ;;  %v53_v63 = vsub.f32 %v47_v38, %v880_v53 }
  0x1d   :  { %v183_v55 = vadd.f32 %v182_v47, %v181_v49  ;;  %v484_v56 = vsel %vm83_vm1, %v457_v50, 0.0  ;;  %v488_v62 = vsel %vm83_vm1, %v458_v51, 0.0  ;;  %v655_v0 = vadd.f32 -127.0, %v880_v53 }
  0x1e   :  { %v485_v59 = vadd.f32 %v484_v56, %v483_v52  ;;  %v453_v2 = vcombine.high %v890_v60, %v890_v60  ;;  %v454_v3 = vcombine.high %v892_v61, %v892_v61  ;;  %v656_v4 = vadd.f32 -127.0, %v888_v58 }
  0x1f   :  { %184 = vadd.xlane.f32.xlu0 %v183_v55  ;;  %v465_v5 = vsel %vm83_vm1, %v890_v60, 0.0  ;;  %v468_v8 = vsel %vm83_vm1, %v892_v61, 0.0  ;;  %v59_v10 = vand.u32 2147483647, %v53_v63  ;;  %v907_v11 = vmul.f32 0.007874016, %v655_v0 }
  0x20   :  { %v487_v1 = vadd.f32 %v486_v57, %v485_v59  ;;  %v466_v7 = vsel %vm83_vm1, %v453_v2, 0.0  ;;  %v470_v12 = vsel %vm83_vm1, %v454_v3, 0.0  ;;  %v910_v13 = vmul.f32 0.007874016, %v656_v4  ;;  %v674_v2 = vld [vmem:[%s1044_s6 + $0x1] ss:$0 sm:$0xff] }
  0x21   :  { %v467_v9 = vadd.f32 %v466_v7, %v465_v5  ;;  %v54_v14 = vsub.f32 %v48_v42, %v888_v58  ;;  %v455_v17 = vcombine.high %v907_v11, %v907_v11  ;;  %v474_v19 = vsel %vm83_vm1, %v907_v11, 0.0 }
  0x22   :  { %v489_v6 = vadd.f32 %v488_v62, %v487_v1  ;;  %v456_v18 = vcombine.high %v910_v13, %v910_v13  ;;  %v71_v21 = vcombine.high %v59_v10, %v59_v10  ;;  %v477_v24 = vsel %vm83_vm1, %v910_v13, 0.0 }
  0x23   :  { %v469_v15 = vadd.f32 %v468_v8, %v467_v9  ;;  %v475_v23 = vsel %vm83_vm1, %v455_v17, 0.0  ;;  %v60_v25 = vand.u32 2147483647, %v54_v14  ;;  %v225_v26 = vmul.f32 %v224_v16, %v890_v60 }
  0x24   :  { %490 = vadd.xlane.f32.xlu1 %v489_v6  ;;  %v476_v27 = vadd.f32 %v475_v23, %v474_v19  ;;  %v211_v29 = vmul.f32 %v209_v22, %v892_v61  ;;  %v227_v30 = vmul.f32 %v224_v16, %v907_v11  ;;  %v479_v31 = vsel %vm83_vm1, %v456_v18, 0.0 }
  0x25   :  { %v471_v20 = vadd.f32 %v470_v12, %v469_v15  ;;  %v55_v32 = vsub.f32 %v880_v53, %v880_v53  ;;  %v210_v34 = vmul.f32 %v209_v22, %v890_v60  ;;  %v84_v36 = vsel %vm83_vm1, %v59_v10, 0.0 }
  0x26   :  { %v478_v35 = vadd.f32 %v477_v24, %v476_v27  ;;  %v85_v37 = vsel %vm83_vm1, %v71_v21, 0.0  ;;  %v214_v38 = vmul.f32 %v209_v22, %v865_v44  ;;  %v212_v39 = vmul.f32 %v209_v22, %v907_v11  ;;  %v675_v21 = vld [vmem:[%s1044_s6 + $0x2] ss:$0 sm:$0xff] }
  0x27   :  { %472 = vadd.xlane.f32.xlu0 %v471_v20  ;;  %v213_v40 = vmul.f32 %v209_v22, %v910_v13  ;;  %v216_v41 = vstv %s1043_s5  ;;  %v660_v42 = vrot.slane %v225_v26, 9  ;;  %v662_v46 = vrot.slane %v227_v30, 9  ;;  %s638_s5 = sshll.u32 %s754_s26, 4  ;;  %s639_s5 = int_to_ptr.vmem [resolvable:$true] %s638_s5 }
  0x28   :  { %v480_v43 = vadd.f32 %v479_v31, %v478_v35  ;;  %v72_v47 = vcombine.high %v60_v25, %v60_v25  ;;  %v86_v48 = vadd.f32 %v85_v37, %v84_v36  ;;  %v215_v49 = vmul.f32 %v209_v22, %v867_v45  ;;  %s728_s27 = scalar_lea.vmem %s639_s5, 64  ;;  %p733_p6 = scmp.lt.s32.totalorder %s639_s5, %s639_s5 }
  0x29   :  { %v940_v50 = vand.u32 2147483647, %v55_v32  ;;  %v87_v51 = vsel %vm83_vm1, %v60_v25, 0.0  ;;  %v217_v52 = vadd.f32 %v216_v41, %v210_v34  ;;  %v218_v54 = vadd.f32 %v216_v41, %v211_v29  ;;  %p729_p5 = scmp.ne.s32.totalorder %s639_s5, %s728_s27  ;;  %p734_p7 = scmp.lt.s32.totalorder %s728_s27, %s728_s27 }
  0x2a   :  { %v219_v55 = vadd.f32 %v216_v41, %v212_v39  ;;  %v220_v56 = vadd.f32 %v216_v41, %v213_v40  ;;  %v221_v57 = vadd.f32 %v216_v41, %v214_v38  ;;  %v226_v59 = vmul.f32 %v224_v16, %v892_v61 }
  0x2b   :  { %481 = vadd.xlane.f32.xlu0 %v480_v43  ;;  %v222_v62 = vadd.f32 %v216_v41, %v215_v49  ;;  %v228_v63 = vmul.f32 %v224_v16, %v910_v13  ;;  %v229_v0 = vmul.f32 %v224_v16, %v865_v44  ;;  %v230_v1 = vmul.f32 %v224_v16, %v867_v45  ;;  %p735_p8 = por %p734_p7, %p733_p6 }
  0x2c   :  { %v88_v3 = vadd.f32 %v87_v51, %v86_v48  ;;  %v89_v4 = vsel %vm83_vm1, %v72_v47, 0.0  ;;  %v661_v5 = vrot.slane %v226_v59, 9  ;;  %v262_v6 = vstv %s928_s0 }
  0x2d   :  { %v663_v7 = vrot.slane %v228_v63, 9  ;;  %v664_v8 = vrot.slane %v229_v0, 9  ;;  %v665_v9 = vrot.slane %v230_v1, 9  ;;  %v255_v10 = vadd.f32 %v660_v42, %v217_v52  ;;  %p736_p9 = pnand %p735_p8, %p729_p5 }
  0x2e   :  { %v257_v12 = vadd.f32 %v662_v46, %v219_v55  ;;  %v263_v14 = vmul.f32 %v262_v6, %v890_v60  ;;  %v264_v15 = vmul.f32 %v262_v6, %v892_v61  ;;  %v265_v16 = vmul.f32 %v262_v6, %v907_v11 }
  0x2f   :  { %v256_v17 = vadd.f32 %v661_v5, %v218_v54  ;;  %v258_v18 = vadd.f32 %v663_v7, %v220_v56  ;;  %v259_v19 = vadd.f32 %v664_v8, %v221_v57  ;;  %v260_v20 = vadd.f32 %v665_v9, %v222_v62  ;;  %v673_v56 = vld [vmem:[%s1044_s6] ss:$0 sm:$0xff] }
  0x30   :  { %v266_v22 = vmul.f32 %v262_v6, %v910_v13  ;;  %v267_v23 = vmul.f32 %v262_v6, %v865_v44  ;;  %v268_v24 = vmul.f32 %v262_v6, %v867_v45  ;;  %v667_v60 = vrot.slane %v263_v14, 10 }
  0x31   :  { %v56_v61 = vsub.f32 %v888_v58, %v888_v58  ;;  %v73_v11 = vcombine.high %v940_v50, %v940_v50  ;;  %v668_v25 = vrot.slane %v264_v15, 10  ;;  %v669_v26 = vrot.slane %v265_v16, 10 }
  0x32   :  { %v670_v27 = vrot.slane %v266_v22, 10  ;;  %v671_v29 = vrot.slane %v267_v23, 10  ;;  %v672_v30 = vrot.slane %v268_v24, 10  ;;  %v293_v31 = vadd.f32 %v667_v60, %v255_v10 }
  0x33   :  { %v90_v32 = vadd.f32 %v89_v4, %v88_v3  ;;  %v91_v44 = vsel %vm83_vm1, %v940_v50, 0.0  ;;  %v294_v13 = vadd.f32 %v668_v25, %v256_v17  ;;  %v295_v45 = vadd.f32 %v669_v26, %v257_v12 }
  0x34   :  { %v296_v34 = vadd.f32 %v670_v27, %v258_v18  ;;  %v297_v35 = vadd.f32 %v671_v29, %v259_v19  ;;  %v298_v36 = vadd.f32 %v672_v30, %v260_v20  ;;  %v299_v37 = vsub.f32 0.0, %v293_v31 }
  0x35   :  { %543 = vbcast.lane.b32.xlu1 %v674_v2, 256  ;;  %v300_v38 = vsub.f32 0.0, %v294_v13  ;;  %v301_v39 = vsub.f32 0.0, %v295_v45  ;;  %v62_v46 = vand.u32 2147483647, %v56_v61  ;;  %v92_v47 = vadd.f32 %v91_v44, %v90_v32 }
  0x36   :  { %v302_v40 = vsub.f32 0.0, %v296_v34  ;;  %v303_v41 = vsub.f32 0.0, %v297_v35  ;;  %v304_v42 = vsub.f32 0.0, %v298_v36  ;;  %v305_v43 = vmul.f32 1.442695, %v299_v37 }
  0x37   :  { %v307_v48 = vmul.f32 1.442695, %v300_v38  ;;  %v309_v49 = vmul.f32 1.442695, %v301_v39  ;;  %v93_v51 = vsel %vm83_vm1, %v73_v11, 0.0  ;;  %v57_v57 = vsub.f32 %v848_v28, %v880_v53 }
  0x38   :  { %692 = vpow2.f32 %v305_v43  ;;  %v311_v50 = vmul.f32 1.442695, %v302_v40  ;;  %v313_v52 = vmul.f32 1.442695, %v303_v41  ;;  %v315_v54 = vmul.f32 1.442695, %v304_v42 }
  0x39   :  { %571 = vbcast.lane.b32.xlu1 %v675_v21, 256  ;;  %694 = vpow2.f32 %v307_v48  ;;  %v94_v55 = vadd.f32 %v93_v51, %v92_v47  ;;  %v74_v59 = vcombine.high %v62_v46, %v62_v46  ;;  %v95_v62 = vsel %vm83_vm1, %v62_v46, 0.0 }
  0x3a   :  { %696 = vpow2.f32 %v309_v49  ;;  %v63_v0 = vand.u32 2147483647, %v57_v57  ;;  %v58_v3 = vsub.f32 %v854_v33, %v888_v58  ;;  %v367_v22 = vlaneseq }
  0x3b   :  { %698 = vpow2.f32 %v311_v50  ;;  %v96_v63 = vadd.f32 %v95_v62, %v94_v55  ;;  %v97_v1 = vsel %vm83_vm1, %v74_v59, 0.0  ;;  %vm348_vm3 = vcmask 1041409  }
  0x3c   :  { %700 = vpow2.f32 %v313_v52  ;;  %v75_v4 = vcombine.high %v63_v0, %v63_v0  ;;  %v99_v5 = vsel %vm83_vm1, %v63_v0, 0.0  ;;  %v64_v12 = vand.u32 2147483647, %v58_v3 }
  0x3d   :  { %702 = vpow2.f32 %v315_v54  ;;  %v98_v2 = vadd.f32 %v97_v1, %v96_v63  ;;  %v982_v60 = vshrl.u32 %v367_v22, 7  ;;  %vm350_vm4 = vcmask 1045509  }
  0x3e   :  { %v101_v14 = vsel %vm83_vm1, %v75_v4, 0.0  ;;  %v76_v20 = vcombine.high %v64_v12, %v64_v12  ;;  %v103_v21 = vsel %vm83_vm1, %v64_v12, 0.0  ;;  %vm353_vm5 = vcmask 1042434  }
  0x3f   :  { %v100_v8 = vadd.f32 %v99_v5, %v98_v2  ;;  %v985_v27 = vsub.s32 0, %v982_v60  ;;  %v373_v29 = vsub.s32 4, %v982_v60  ;;  %vm355_vm6 = vcmask 1046534  }
  0x40   :  { %v105_v24 = vsel %vm83_vm1, %v76_v20, 0.0  ;;  %vm628_vm8 = vcmask 8192   ;;  %vm622_vm9 = vcmask 43008  }
  0x41   :  { %515 = vbcast.lane.b32.xlu0 %v673_v56, 256  ;;  %v102_v58 = vadd.f32 %v101_v14, %v100_v8 }
  0x43   :  { %v104_v23 = vadd.f32 %v103_v21, %v102_v58 }
  0x45   :  { %v693_v6 = vpop.eup %692  ;;  %v106_v61 = vadd.f32 %v105_v24, %v104_v23  ;;  %v676_v23 = vld [vmem:[%s1045_s7] ss:$0 sm:$0xff]  ;;  %v753_v24 = vmov 0  }
  0x46   :  { %v695_v7 = vpop.eup %694  ;;  %v317_v28 = vadd.f32 1.0, %v693_v6  ;;  %691 = vset.pattern.permute.xlu1 %v753_v24  ;;  %690 = vset.pattern.permute.xlu0 %v753_v24 }
  0x47   :  { %v697_v53 = vpop.eup %696  ;;  %v318_v9 = vadd.f32 1.0, %v695_v7 }
  0x48   :  { %v699_v10 = vpop.eup %698  ;;  %v319_v15 = vadd.f32 1.0, %v697_v53  ;;  %704 = vrcp.f32 %v317_v28 }
  0x49   :  { %v701_v16 = vpop.eup %700  ;;  %v320_v17 = vadd.f32 1.0, %v699_v10  ;;  %706 = vrcp.f32 %v318_v9 }
  0x4a   :  { %v703_v18 = vpop.eup %702  ;;  %v321_v33 = vadd.f32 1.0, %v701_v16  ;;  %708 = vrcp.f32 %v319_v15 }
  0x4b   :  { %v322_v19 = vadd.f32 1.0, %v703_v18  ;;  %710 = vrcp.f32 %v320_v17 }
  0x4c   :  { %712 = vrcp.f32 %v321_v33 }
  0x4d   :  { %714 = vrcp.f32 %v322_v19 }
  0x55   :  { %v705_v11 = vpop.eup %704 }
  0x56   :  { %v707_v25 = vpop.eup %706  ;;  %v329_v26 = vmul.f32 0.3, %v705_v11 }
  0x57   :  { %v709_v30 = vpop.eup %708  ;;  %v330_v31 = vmul.f32 0.3, %v707_v25 }
  0x58   :  { %v711_v32 = vpop.eup %710  ;;  %v331_v44 = vmul.f32 0.3, %v709_v30  ;;  %v335_v13 = vadd.f32 0.01, %v329_v26 }
  0x59   :  { %v713_v45 = vpop.eup %712  ;;  %v332_v34 = vmul.f32 0.3, %v711_v32  ;;  %v336_v35 = vadd.f32 0.01, %v330_v31 }
  0x5a   :  { %v715_v36 = vpop.eup %714  ;;  %v333_v37 = vmul.f32 0.3, %v713_v45  ;;  %v337_v38 = vadd.f32 0.01, %v331_v44  ;;  %v370_v39 = vrot.slane %v335_v13, %v985_v27  ;;  %v374_v40 = vrot.slane %v335_v13, %v373_v29 }
  0x5b   :  { %v334_v41 = vmul.f32 0.3, %v715_v36  ;;  %v338_v42 = vadd.f32 0.01, %v332_v34  ;;  %v378_v43 = vrot.slane %v336_v35, %v985_v27  ;;  %v382_v46 = vrot.slane %v336_v35, %v373_v29 }
  0x5c   :  { %v339_v47 = vadd.f32 0.01, %v333_v37  ;;  %v347_v48 = vrot.slane %v337_v38, 7  ;;  %v386_v49 = vrot.slane %v337_v38, %v985_v27  ;;  %v390_v51 = vrot.slane %v337_v38, %v373_v29 }
  0x5d   :  { %107 = vadd.xlane.f32.xlu1 %v106_v61  ;;  %v340_v50 = vadd.f32 0.01, %v334_v41  ;;  %v357_v52 = vrot.slane %v338_v42, 7  ;;  %v394_v54 = vrot.slane %v338_v42, %v985_v27  ;;  %v398_v55 = vrot.slane %v338_v42, %v373_v29 }
  0x5e   :  { %v349_v56 = vsel %vm348_vm3, %v347_v48, %v335_v13  ;;  %v352_v57 = vrot.slane %v339_v47, 6  ;;  %v402_v59 = vrot.slane %v339_v47, %v985_v27  ;;  %v406_v62 = vrot.slane %v339_v47, %v373_v29 }
  0x5f   :  { %v351_v63 = vsel %vm350_vm4, %v347_v48, %v349_v56  ;;  %v358_v0 = vsel %vm348_vm3, %v357_v52, %v336_v35  ;;  %v360_v1 = vrot.slane %v340_v50, 6  ;;  %v410_v2 = vrot.slane %v340_v50, %v985_v27 }
  0x60   :  { %v354_v3 = vsel %vm353_vm5, %v352_v57, %v351_v63  ;;  %v359_v4 = vsel %vm350_vm4, %v357_v52, %v358_v0  ;;  %v414_v5 = vrot.slane %v340_v50, %v373_v29  ;;  %v415_v6 = vsel %vm348_vm3, %v386_v49, %v370_v39 }
  0x61   :  { %v356_v7 = vsel %vm355_vm6, %v352_v57, %v354_v3  ;;  %v361_v28 = vsel %vm353_vm5, %v360_v1, %v359_v4  ;;  %v416_v53 = vsel %vm353_vm5, %v402_v59, %v415_v6  ;;  %v417_v8 = vsel %vm348_vm3, %v390_v51, %v374_v40 }
  0x62   :  { %v362_v9 = vsel %vm355_vm6, %v360_v1, %v361_v28  ;;  %365 = vst [vmem:[%s1046_s8] sm:$0x77] %v356_v7  ;;  %v418_v10 = vsel %vm353_vm5, %v406_v62, %v417_v8  ;;  %v419_v12 = vsel %vm348_vm3, %v394_v54, %v378_v43  ;;  %v421_v14 = vsel %vm348_vm3, %v398_v55, %v382_v46 }
  0x63   :  { %366 = vst [vmem:[%s1046_s8 + $0x8] sm:$0x77] %v362_v9  ;;  %v420_v15 = vsel %vm353_vm5, %v410_v2, %v419_v12  ;;  %v422_v16 = vsel %vm353_vm5, %v414_v5, %v421_v14  ;;  %v427_v17 = vsel %vm83_vm1, %v416_v53, 0.0  ;;  %v428_v18 = vsel %vm83_vm1, %v418_v10, 0.0 }
  0x64   :  { %v429_v33 = vadd.f32 %v428_v18, %v427_v17  ;;  %v430_v58 = vsel %vm83_vm1, %v420_v15, 0.0  ;;  %v432_v19 = vsel %vm83_vm1, %v422_v16, 0.0  ;;  %v527_v50 = vsub.s32 1, %v982_v60 }
  0x65   :  { %v555_v5 = vsub.s32 2, %v982_v60 }
  0x66   :  { %v431_v20 = vadd.f32 %v430_v58, %v429_v33 }
  0x68   :  { %v433_v21 = vadd.f32 %v432_v19, %v431_v20 }
  0x6a   :  { %434 = vadd.xlane.f32.xlu1 %v433_v21 }
  0x7b   :  { %587 = vbcast.lane.b32.xlu1 %v676_v23, 256 }
  0xa2   :  { %v159_v61 = vpop.xlane.xlu1 %158 }
  0xa3   :  { %v133_v25 = vpop.xlane.xlu0 %132  ;;  %v160_v31 = vrot.slane %v159_v61, 4 }
  0xa4   :  { %v134_v30 = vrot.slane %v133_v25, 4 }
  0xa5   :  { %v161_v45 = vadd.f32 %v160_v31, %v159_v61 }
  0xa6   :  { %v135_v44 = vadd.f32 %v134_v30, %v133_v25 }
  0xa7   :  { %v162_v38 = vrot.slane %v161_v45, 2 }
  0xa8   :  { %v185_v29 = vpop.xlane.xlu0 %184  ;;  %v136_v36 = vrot.slane %v135_v44, 2 }
  0xa9   :  { %v186_v32 = vrot.slane %v185_v29, 4  ;;  %v163_v47 = vadd.f32 %v162_v38, %v161_v45 }
  0xaa   :  { %v137_v43 = vadd.f32 %v136_v36, %v135_v44 }
  0xab   :  { %v187_v35 = vadd.f32 %v186_v32, %v185_v29  ;;  %v164_v56 = vrot.slane %v163_v47, 1 }
  0xac   :  { %v138_v54 = vrot.slane %v137_v43, 1 }
  0xad   :  { %v491_v11 = vpop.xlane.xlu1 %490  ;;  %v188_v40 = vrot.slane %v187_v35, 2  ;;  %v165_v6 = vadd.f32 %v164_v56, %v163_v47 }
  0xae   :  { %v495_v0 = vmul.f32 0.001953125, %v491_v11  ;;  %v139_v4 = vadd.f32 %v138_v54, %v137_v43 }
  0xaf   :  { %v189_v49 = vadd.f32 %v188_v40, %v187_v35 }
  0xb0   :  { %v473_v34 = vpop.xlane.xlu0 %472  ;;  %v508_v9 = vrot.slane %v495_v0, %v985_v27  ;;  %v536_v10 = vrot.slane %v495_v0, %v527_v50  ;;  %v564_v23 = vrot.slane %v495_v0, %v555_v5 }
  0xb1   :  { %v544_v26 = vpop.permute.xlu1 %543  ;;  %v493_v52 = vmul.f32 0.001953125, %v473_v34  ;;  %v190_v63 = vrot.slane %v189_v49, 1 }
  0xb2   :  { %v548_v58 = vmul.f32 %v544_v26, %v536_v10 }
  0xb3   :  { %v500_v57 = vrot.slane %v493_v52, %v985_v27  ;;  %v528_v3 = vrot.slane %v493_v52, %v527_v50  ;;  %v191_v8 = vadd.f32 %v190_v63, %v189_v49  ;;  %v556_v14 = vrot.slane %v493_v52, %v555_v5 }
  0xb4   :  { %v482_v41 = vpop.xlane.xlu0 %481 }
  0xb5   :  { %v572_v13 = vpop.permute.xlu1 %571  ;;  %v494_v48 = vmul.f32 0.001953125, %v482_v41  ;;  %v546_v12 = vmul.f32 %v544_v26, %v528_v3 }
  0xb6   :  { %v574_v19 = vmul.f32 %v572_v13, %v556_v14  ;;  %v576_v29 = vmul.f32 %v572_v13, %v564_v23 }
  0xb7   :  { %v504_v59 = vrot.slane %v494_v48, %v985_v27  ;;  %v532_v62 = vrot.slane %v494_v48, %v527_v50  ;;  %v560_v15 = vrot.slane %v494_v48, %v555_v5 }
  0xb8   :  { %v516_v1 = vpop.permute.xlu0 %515 }
  0xb9   :  { %v547_v7 = vmul.f32 %v544_v26, %v532_v62  ;;  %v518_v28 = vmul.f32 %v516_v1, %v500_v57  ;;  %v519_v53 = vmul.f32 %v516_v1, %v504_v59  ;;  %v520_v16 = vmul.f32 %v516_v1, %v508_v9 }
  0xba   :  { %v575_v20 = vmul.f32 %v572_v13, %v560_v15  ;;  %v606_v13 = vand.u32 127, %v367_v22 }
  0xbb   :  { %v549_v17 = vadd.f32 %v546_v12, %v518_v28  ;;  %v550_v18 = vadd.f32 %v547_v7, %v519_v53  ;;  %v551_v24 = vadd.f32 %v548_v58, %v520_v16 }
  0xbc   :  { %vm624_vm7 = vcmp.eq.s32.totalorder %v606_v13, 0 }
  0xbd   :  { %v577_v11 = vadd.f32 %v574_v19, %v549_v17  ;;  %v578_v25 = vadd.f32 %v575_v20, %v550_v18  ;;  %v579_v44 = vadd.f32 %v576_v29, %v551_v24 }
  0xe6   :  { %v108_v37 = vpop.xlane.xlu1 %107 }
  0xe7   :  { %v109_v39 = vrot.slane %v108_v37, 4 }
  0xe9   :  { %v110_v42 = vadd.f32 %v109_v39, %v108_v37  ;;  %v609_v39 = vsub.s32 %v606_v13, %v982_v60 }
  0xeb   :  { %v111_v46 = vrot.slane %v110_v42, 2 }
  0xed   :  { %v112_v51 = vadd.f32 %v111_v46, %v110_v42 }
  0xef   :  { %v113_v55 = vrot.slane %v112_v51, 1 }
  0xf1   :  { %v114_v2 = vadd.f32 %v113_v55, %v112_v51 }
  0xf3   :  { %677 = vpush %v114_v2  ;;  %v435_v33 = vpop.xlane.xlu1 %434 }
  0xf4   :  { %679 = vpush %v139_v4  ;;  %v436_v21 = vrot.slane %v435_v33, 4 }
  0xf5   :  { %681 = vpush %v165_v6 }
  0xf6   :  { %683 = vpush %v191_v8  ;;  %v437_v61 = vadd.f32 %v436_v21, %v435_v33 }
  0xf7   :  { %v588_v27 = vpop.permute.xlu1 %587 }
  0xf8   :  { %v438_v30 = vrot.slane %v437_v61, 2  ;;  %v590_v31 = vadd.f32 %v588_v27, %v577_v11  ;;  %v591_v32 = vadd.f32 %v588_v27, %v578_v25  ;;  %v592_v34 = vadd.f32 %v588_v27, %v579_v44 }
  0xfa   :  { %600 = vperm.xlu1 %691, %v591_v32   ;;  %597 = vperm.xlu0 %690, %v590_v31   ;;  %v439_v45 = vadd.f32 %v438_v30, %v437_v61 }
  0xfc   :  { %v440_v35 = vrot.slane %v439_v45, 1 }
  0xfe   :  { %603 = vperm.xlu1 %691, %v592_v34   ;;  %v441_v26 = vadd.f32 %v440_v35, %v439_v45 }
 0x100   :  { %685 = vpush %v441_v26 }
 0x124   :  { %s678_s7 = spop %677 }
 0x125   :  { %s680_s8 = spop %679  ;;  %s116_s15 = smul.f32 0.00032552084, %s678_s7 }
 0x126   :  { %s141_s16 = smul.f32 0.0013020834, %s680_s8  ;;  %s682_s3 = spop %681 }
 0x127   :  { %s167_s18 = smul.f32 0.0052083335, %s682_s3  ;;  %s684_s19 = spop %683 }
 0x128   :  { %s142_s17 = sadd.f32 %s141_s16, %s116_s15  ;;  %s193_s21 = smul.f32 0.020833334, %s684_s19 }
 0x12a   :  { %s168_s20 = sadd.f32 %s167_s18, %s142_s17 }
 0x12c   :  { %s194_s4 = sadd.f32 %s193_s21, %s168_s20 }
 0x12e   :  { %v625_v36 = vstv %s194_s4 }
 0x131   :  { %s686_s22 = spop %685 }
 0x132   :  { %s445_s23 = smul.f32 0.0006510417, %s686_s22 }
 0x134   :  { %s446_s24 = smul.f32 0.1, %s445_s23 }
 0x136   :  { %v626_v37 = vstv %s446_s24 }
 0x137   :  { %v627_v38 = vsel %vm624_vm7, %v625_v36, %v626_v37 }
 0x138   :  { %629 = vst.msk [vmem:[%s1048_s10] sm:$0x1] %vm628_vm8, %v627_v38 }
 0x175   :  { %v601_v40 = vpop.permute.xlu1 %600  ;;  %v598_v41 = vpop.permute.xlu0 %597 }
 0x176   :  { %v614_v42 = vrot.slane %v601_v40, %v609_v39  ;;  %v610_v43 = vrot.slane %v598_v41, %v609_v39 }
 0x178   :  { %v619_v47 = vsel %vm348_vm3, %v614_v42, %v610_v43 }
 0x179   :  { %v604_v22 = vpop.permute.xlu1 %603 }
 0x17a   :  { %v618_v46 = vrot.slane %v604_v22, %v609_v39 }
 0x17c   :  { %v620_v48 = vsel %vm353_vm5, %v618_v46, %v619_v47 }
 0x17d   :  { %623 = vst.msk [vmem:[#allocation6] sm:$0x7] %vm622_vm9, %v620_v48 }
 0x17e   :  { %739 = shalt.err (!%p736_p9)
}
 0x17f   :  { %641 = dma.vmem_to_hbm [thread:$0]  %s639_s5, 64, %s1047_s9, [#allocation4]  }
 0x180   :  { %750 = dma.done.wait [#allocation4], 64  }
 0x181   :  { %751 = vsyncadd [#allocation4], 4294967232 }
 0x182   :  { %651 = vsyncpa [#allocation4], 1 }
 0x183   :  { %652 = vsyncpa [#allocation5], 1 }

// kernel: _forward_impl.3
= control target key start
LH: loop header
LB: loop body
LE: loop exit
PB: predicated region body
PF: predicated region fallthrough
CT: control target
= control target key end

     0   :  { %13 = vsyncpa [#allocation4], 0  ;;  %s2376_s0 = inlined_call_operand.vmem [shape: f32[3,3,4,8], index: 0, kind: input, shape index: {}]   ;;  %s2377_s1 = inlined_call_operand.vmem [shape: f32[3,3,2,4], index: 1, kind: input, shape index: {}]   ;;  %s2378_s2 = inlined_call_operand.vmem [shape: f32[3,4,8], index: 2, kind: input, shape index: {}]   ;;  %s2379_s3 = inlined_call_operand.vmem [shape: f32[3,2,4], index: 3, kind: input, shape index: {}]   ;;  %s2380_s4 = inlined_call_operand.vmem [shape: f32[3], index: 4, kind: input, shape index: {}]   ;;  %s2381_s5 = inlined_call_operand.<no memory space> [shape: f32[1], index: 5, kind: input, shape index: {}]   ;;  %s2382_s6 = inlined_call_operand.vmem [shape: f32[1,2], index: 6, kind: input, shape index: {}]   ;;  %s2383_s7 = inlined_call_operand.vmem [shape: f32[1,4], index: 7, kind: output, shape index: {}]  }
   0x1   :  { %s29_s26 = sshll.u32 %s2380_s4, 4  ;;  %s30_s26 = int_to_ptr.vmem [resolvable:$true] %s29_s26 }
   0x2   :  { %14 = vsyncpa [#allocation6], 0  ;;  %s41_s29 = sshll.u32 %s2382_s6, 4  ;;  %s1353_s30 = scalar_lea.vmem %s30_s26, 16  ;;  %s42_s29 = int_to_ptr.vmem [resolvable:$true] %s41_s29 }
   0x3   :  { %p1354_p0 = scmp.ne.s32.totalorder %s30_s26, %s1353_s30  ;;  %p1358_p1 = scmp.lt.s32.totalorder %s30_s26, %s30_s26 }
   0x4   :  { %p1359_p2 = scmp.lt.s32.totalorder %s1353_s30, %s1353_s30 }
   0x6   :  { %p1360_p3 = por %p1359_p2, %p1358_p1 }
   0x8   :  { %p1361_p4 = pnand %p1360_p3, %p1354_p0 }
   0xa   :  { %1364 = shalt.err (!%p1361_p4)
}
   0xb   :  { %s1381_s8 = smov [#allocation3]   ;;  %s1365_s9 = scalar_lea.vmem %s42_s29, 16 }
   0xc   :  { %32 = dma.vmem_to_smem %s30_s26, 16, %s1381_s8, [#allocation4]  }
   0xd   :  { %p1366_p5 = scmp.ne.s32.totalorder %s42_s29, %s1365_s9  ;;  %p1370_p6 = scmp.lt.s32.totalorder %s42_s29, %s42_s29 }
   0xe   :  { %p1371_p7 = scmp.lt.s32.totalorder %s1365_s9, %s1365_s9 }
  0x10   :  { %p1372_p8 = por %p1371_p7, %p1370_p6 }
  0x12   :  { %p1373_p9 = pnand %p1372_p8, %p1366_p5 }
  0x14   :  { %1376 = shalt.err (!%p1373_p9)
}
  0x15   :  { %s1382_s4 = smov [#allocation5]  }
  0x16   :  { %44 = dma.vmem_to_smem %s42_s29, 16, %s1382_s4, [#allocation6]  }
  0x17   :  { %1377 = dma.done.wait [#allocation4], 16  }
  0x18   :  { %1378 = vsyncadd [#allocation4], 4294967280 }
  0x19   :  { %1379 = dma.done.wait [#allocation6], 16  }
  0x1a   :  { %1380 = vsyncadd [#allocation6], 4294967280 }
  0x1b   :  { %51 = sfence }
  0x1c   :  { %v1437_v0 = vld [vmem:[%s2376_s0] sm:$0xf]  ;;  %s82_s11 = sld [smem:[#allocation3]]  ;;  %s1383_s12 = smov 8   ;;  %v1445_v2 = vld [vmem:[%s2376_s0 + $0xc] sm:$0xf]  ;;  %v1471_v12 = vstv %s2381_s5 }
  0x1d   :  { %142 = vrot.lane.b32.xlu0 %v1437_v0, %s1383_s12  ;;  %v1233_v1 = vadd.f32 -127.0, %v1437_v0  ;;  %v1450_v3 = vld [vmem:[%s2376_s0 + $0x4] sm:$0xf]  ;;  %151 = vrot.lane.b32.xlu1 %v1445_v2, %s1383_s12  ;;  %v1236_v4 = vadd.f32 -127.0, %v1445_v2  ;;  %s1242_s17 = sld [smem:[#allocation3 + $0x1]]  ;;  %s1384_s30 = smov 4  }
  0x1e   :  { %v1234_v5 = vadd.f32 -127.0, %v1450_v3  ;;  %v1459_v6 = vld [vmem:[%s2376_s0 + $0x10] sm:$0xf]  ;;  %v1465_v9 = vld [vmem:[%s2377_s1] sm:$0x3]  ;;  %s1243_s29 = sld [smem:[#allocation3 + $0x2]] }
  0x1f   :  { %v72_v7 = vmul.f32 0.007874016, %v1233_v1  ;;  %v1237_v8 = vadd.f32 -127.0, %v1459_v6  ;;  %v75_v10 = vmul.f32 0.007874016, %v1236_v4  ;;  %v1246_v11 = vadd.f32 -127.0, %v1465_v9 }
  0x20   :  { %v73_v13 = vmul.f32 0.007874016, %v1234_v5  ;;  %v1478_v14 = vld [vmem:[%s2377_s1 + $0x2] sm:$0x3]  ;;  %v1483_v15 = vld [vmem:[%s2377_s1 + $0x6] sm:$0x3] }
  0x21   :  { %145 = vrot.lane.b32.xlu0 %v1450_v3, %s1383_s12  ;;  %154 = vrot.lane.b32.xlu1 %v1459_v6, %s1383_s12  ;;  %v653_v17 = vmul.f32 0.007874016, %v1246_v11  ;;  %v1247_v18 = vadd.f32 -127.0, %v1478_v14  ;;  %v1249_v19 = vadd.f32 -127.0, %v1483_v15  ;;  %v1494_v20 = vld [vmem:[%s2377_s1 + $0x8] sm:$0x3] }
  0x22   :  { %v1485_v16 = vstv %s82_s11  ;;  %v76_v23 = vmul.f32 0.007874016, %v1237_v8  ;;  %v1250_v24 = vadd.f32 -127.0, %v1494_v20  ;;  %v1507_v29 = vld [vmem:[%s2376_s0 + $0x8] sm:$0xf]  ;;  %s1385_s15 = smov 1  }
  0x23   :  { %v84_v21 = vmul.f32 %v1485_v16, %v72_v7  ;;  %v85_v22 = vmul.f32 %v1485_v16, %v75_v10  ;;  %v1499_v25 = vstv %s1242_s17  ;;  %v662_v26 = vmul.f32 %v653_v17, %v1485_v16  ;;  %v1512_v30 = vld [vmem:[%s2376_s0 + $0x14] sm:$0xf]  ;;  %v1522_v35 = vld [vmem:[%s2376_s0 + $0x18] sm:$0xf]  ;;  %v1527_v36 = vld [vmem:[%s2376_s0 + $0x1c] sm:$0xf] }
  0x24   :  { %v654_v27 = vmul.f32 0.007874016, %v1247_v18  ;;  %v656_v28 = vmul.f32 0.007874016, %v1249_v19  ;;  %v93_v33 = vmul.f32 %v1499_v25, %v73_v13  ;;  %v657_v34 = vmul.f32 0.007874016, %v1250_v24 }
  0x25   :  { %711 = vrot.lane.b32.xlu0 %v1465_v9, %s1384_s30  ;;  %v88_v31 = vadd.f32 %v1471_v12, %v84_v21  ;;  %v89_v32 = vadd.f32 %v1471_v12, %v85_v22  ;;  %714 = vrot.lane.b32.xlu1 %v1478_v14, %s1384_s30  ;;  %v1235_v38 = vadd.f32 -127.0, %v1507_v29  ;;  %v1238_v39 = vadd.f32 -127.0, %v1512_v30  ;;  %v1536_v41 = vld [vmem:[%s2377_s1 + $0x4] sm:$0x3]  ;;  %v1541_v42 = vld [vmem:[%s2377_s1 + $0xa] sm:$0x3] }
  0x26   :  { %v663_v37 = vmul.f32 %v656_v28, %v1485_v16  ;;  %v1239_v40 = vadd.f32 -127.0, %v1522_v35  ;;  %v94_v43 = vmul.f32 %v1499_v25, %v76_v23  ;;  %v665_v44 = vadd.f32 %v662_v26, %v1471_v12  ;;  %v1550_v47 = vld [vmem:[%s2377_s1 + $0xc] sm:$0x3]  ;;  %v1555_v48 = vld [vmem:[%s2376_s0 + $0x20] sm:$0xf]  ;;  %s52_s16 = sld [smem:[#allocation5]] }
  0x27   :  { %v668_v45 = vmul.f32 %v654_v27, %v1499_v25  ;;  %v1240_v46 = vadd.f32 -127.0, %v1527_v36  ;;  %v74_v49 = vmul.f32 0.007874016, %v1235_v38  ;;  %v100_v50 = vstv %s1243_s29  ;;  %v1570_v61 = vld [vmem:[%s2377_s1 + $0xe] sm:$0x3] }
  0x28   :  { %v77_v51 = vmul.f32 0.007874016, %v1238_v39  ;;  %v78_v52 = vmul.f32 0.007874016, %v1239_v40  ;;  %v1248_v54 = vadd.f32 -127.0, %v1536_v41  ;;  %v1251_v55 = vadd.f32 -127.0, %v1541_v42 }
  0x29   :  { %720 = vrot.lane.b32.xlu0 %v1483_v15, %s1384_s30  ;;  %723 = vrot.lane.b32.xlu1 %v1494_v20, %s1384_s30  ;;  %v79_v53 = vmul.f32 0.007874016, %v1240_v46  ;;  %v1252_v56 = vadd.f32 -127.0, %v1550_v47  ;;  %v666_v57 = vadd.f32 %v663_v37, %v1471_v12  ;;  %v669_v58 = vmul.f32 %v657_v34, %v1499_v25  ;;  %v1575_v62 = vld [vmem:[%s2377_s1 + $0x10] sm:$0x3] }
  0x2a   :  { %v101_v59 = vmul.f32 %v100_v50, %v74_v49  ;;  %v86_v60 = vmul.f32 %v1485_v16, %v78_v52  ;;  %v102_v63 = vmul.f32 %v100_v50, %v77_v51  ;;  %v655_v1 = vmul.f32 0.007874016, %v1248_v54 }
  0x2b   :  { %v658_v4 = vmul.f32 0.007874016, %v1251_v55  ;;  %v659_v5 = vmul.f32 0.007874016, %v1252_v56  ;;  %v95_v8 = vmul.f32 %v1499_v25, %v79_v53  ;;  %v1253_v10 = vadd.f32 -127.0, %v1570_v61 }
  0x2c   :  { %v90_v7 = vadd.f32 %v1471_v12, %v86_v60  ;;  %v1241_v11 = vadd.f32 -127.0, %v1555_v48  ;;  %v674_v13 = vmul.f32 %v655_v1, %v100_v50  ;;  %v1254_v19 = vadd.f32 -127.0, %v1575_v62  ;;  %v1622_v60 = vld [vmem:[%s2379_s3] sm:$0x3] }
  0x2d   :  { %148 = vrot.lane.b32.xlu0 %v1507_v29, %s1383_s12  ;;  %157 = vrot.lane.b32.xlu1 %v1512_v30, %s1383_s12  ;;  %v675_v17 = vmul.f32 %v658_v4, %v100_v50  ;;  %v664_v18 = vmul.f32 %v659_v5, %v1485_v16  ;;  %v660_v21 = vmul.f32 0.007874016, %v1253_v10  ;;  %v96_v23 = vadd.f32 %v93_v33, %v88_v31 }
  0x2e   :  { %v80_v22 = vmul.f32 0.007874016, %v1241_v11  ;;  %v97_v24 = vadd.f32 %v94_v43, %v89_v32  ;;  %v661_v27 = vmul.f32 0.007874016, %v1254_v19  ;;  %v671_v28 = vadd.f32 %v668_v45, %v665_v44  ;;  %v1636_v11 = vld [vmem:[%s2378_s2 + $0x8] sm:$0xf] }
  0x2f   :  { %v667_v26 = vadd.f32 %v664_v18, %v1471_v12  ;;  %v672_v34 = vadd.f32 %v669_v58, %v666_v57  ;;  %v670_v37 = vmul.f32 %v660_v21, %v1499_v25  ;;  %v104_v39 = vadd.f32 %v101_v59, %v96_v23  ;;  %v1608_v58 = vld [vmem:[%s2378_s2] sm:$0xf]  ;;  %v1613_v59 = vld [vmem:[%s2378_s2 + $0x4] sm:$0xf] }
  0x30   :  { %v103_v38 = vmul.f32 %v100_v50, %v80_v22  ;;  %v105_v40 = vadd.f32 %v102_v63, %v97_v24  ;;  %v676_v16 = vmul.f32 %v661_v27, %v100_v50  ;;  %v677_v46 = vadd.f32 %v674_v13, %v671_v28  ;;  %v1627_v63 = vld [vmem:[%s2379_s3 + $0x2] sm:$0x3] }
  0x31   :  { %160 = vrot.lane.b32.xlu0 %v1522_v35, %s1383_s12  ;;  %163 = vrot.lane.b32.xlu1 %v1527_v36, %s1383_s12  ;;  %v678_v31 = vadd.f32 %v675_v17, %v672_v34  ;;  %v98_v32 = vadd.f32 %v95_v8, %v90_v7  ;;  %v107_v33 = vsub.f32 0.0, %v104_v39  ;;  %v673_v43 = vadd.f32 %v670_v37, %v667_v26 }
  0x32   :  { %v108_v12 = vsub.f32 0.0, %v105_v40  ;;  %v680_v44 = vsub.f32 0.0, %v677_v46  ;;  %vm141_vm0 = vcmask 1047616   ;;  %vm277_vm1 = vcmask 1047556  }
  0x33   :  { %v681_v45 = vsub.f32 0.0, %v678_v31  ;;  %v106_v49 = vadd.f32 %v103_v38, %v98_v32  ;;  %v110_v25 = vmul.f32 1.442695, %v107_v33  ;;  %v679_v52 = vadd.f32 %v676_v16, %v673_v43 }
  0x34   :  { %v112_v51 = vmul.f32 1.442695, %v108_v12  ;;  %v683_v53 = vmul.f32 1.442695, %v680_v44  ;;  %v1661_v44 = vld [vmem:[%s2379_s3 + $0x4] sm:$0x3] }
  0x35   :  { %717 = vrot.lane.b32.xlu0 %v1536_v41, %s1384_s30  ;;  %726 = vrot.lane.b32.xlu1 %v1541_v42, %s1384_s30  ;;  %v685_v50 = vmul.f32 1.442695, %v681_v45  ;;  %v109_v54 = vsub.f32 0.0, %v106_v49  ;;  %1279 = vpow2.f32 %v110_v25  ;;  %v682_v55 = vsub.f32 0.0, %v679_v52 }
  0x36   :  { %1281 = vpow2.f32 %v112_v51  ;;  %v284_v52 = vrot.slane %v1445_v2, 4  ;;  %vm710_vm2 = vcmask 1047584   ;;  %vm350_vm3 = vcmask 61441  }
  0x37   :  { %v114_v56 = vmul.f32 1.442695, %v109_v54  ;;  %1283 = vpow2.f32 %v683_v53  ;;  %v687_v57 = vmul.f32 1.442695, %v682_v55  ;;  %v286_v53 = vrot.slane %v1459_v6, 4 }
  0x38   :  { %1285 = vpow2.f32 %v685_v50  ;;  %vm845_vm6 = vcmask 1047554   ;;  %vm918_vm9 = vcmask 26625   ;;  %vm250_vm10 = vcmask 68616  }
  0x39   :  { %729 = vrot.lane.b32.xlu0 %v1550_v47, %s1384_s30  ;;  %732 = vrot.lane.b32.xlu1 %v1570_v61, %s1384_s30  ;;  %1287 = vpow2.f32 %v114_v56  ;;  %vm819_vm11 = vcmask 33800   ;;  %vm495_vm12 = vcmask 60416   ;;  %vm1063_vm13 = vcmask 25600  }
  0x3a   :  { %1289 = vpow2.f32 %v687_v57  ;;  %v285_v57 = vsel %vm277_vm1, %v284_v52, %v1445_v2  ;;  %v319_v52 = vrot.slane %v1512_v30, 7 }
  0x3d   :  { %166 = vrot.lane.b32.xlu0 %v1555_v48, %s1383_s12  ;;  %735 = vrot.lane.b32.xlu1 %v1575_v62, %s1384_s30 }
  0x41   :  { %514 = vrot.lane.b32.xlu0 %v1608_v58, %s1383_s12  ;;  %517 = vrot.lane.b32.xlu1 %v1613_v59, %s1383_s12 }
  0x42   :  { %v1280_v1 = vpop.eup %1279 }
  0x43   :  { %v1282_v4 = vpop.eup %1281  ;;  %v116_v5 = vadd.f32 1.0, %v1280_v1  ;;  %v287_v1 = vsel %vm277_vm1, %v286_v53, %v1459_v6 }
  0x44   :  { %v1284_v7 = vpop.eup %1283  ;;  %v117_v8 = vadd.f32 1.0, %v1282_v4 }
  0x45   :  { %1082 = vrot.lane.b32.xlu0 %v1622_v60, %s1384_s30  ;;  %1085 = vrot.lane.b32.xlu1 %v1627_v63, %s1384_s30  ;;  %v1286_v10 = vpop.eup %1285  ;;  %1291 = vrcp.f32 %v116_v5  ;;  %v689_v13 = vadd.f32 1.0, %v1284_v7  ;;  %v288_v7 = vrot.slane %v1512_v30, 4 }
  0x46   :  { %v1288_v17 = vpop.eup %1287  ;;  %1293 = vrcp.f32 %v117_v8  ;;  %v690_v18 = vadd.f32 1.0, %v1286_v10 }
  0x47   :  { %v1290_v19 = vpop.eup %1289  ;;  %1295 = vrcp.f32 %v689_v13  ;;  %v118_v21 = vadd.f32 1.0, %v1288_v17  ;;  %v299_v13 = vrot.slane %v285_v57, 4  ;;  %v300_v17 = vrot.slane %v287_v1, 4 }
  0x48   :  { %1297 = vrcp.f32 %v690_v18  ;;  %v691_v22 = vadd.f32 1.0, %v1290_v19  ;;  %v278_v18 = vrot.slane %v1437_v0, 4  ;;  %v131_v1 = vlaneseq }
  0x49   :  { %520 = vrot.lane.b32.xlu1 %v1636_v11, %s1383_s12  ;;  %1299 = vrcp.f32 %v118_v21  ;;  %v280_v21 = vrot.slane %v1450_v3, 4 }
  0x4a   :  { %1301 = vrcp.f32 %v691_v22 }
  0x52   :  { %v1292_v23 = vpop.eup %1291 }
  0x53   :  { %v1294_v24 = vpop.eup %1293  ;;  %v122_v26 = vmul.f32 0.3, %v1292_v23  ;;  %v289_v23 = vsel %vm277_vm1, %v288_v7, %v1512_v30 }
  0x54   :  { %v1296_v27 = vpop.eup %1295  ;;  %v123_v28 = vmul.f32 0.3, %v1294_v24  ;;  %v317_v24 = vrot.slane %v1445_v2, 7 }
  0x55   :  { %v1298_v34 = vpop.eup %1297  ;;  %v1640_v37 = vadd.f32 0.01, %v122_v26  ;;  %v695_v38 = vmul.f32 0.3, %v1296_v27  ;;  %v318_v26 = vrot.slane %v1459_v6, 7 }
  0x56   :  { %v1300_v39 = vpop.eup %1299  ;;  %v1642_v40 = vadd.f32 0.01, %v123_v28  ;;  %v696_v16 = vmul.f32 0.3, %v1298_v34  ;;  %v308_v34 = vsel %vm277_vm1, %v299_v13, %v1445_v2  ;;  %v315_v13 = vrot.slane %v1450_v3, 7 }
  0x57   :  { %393 = vrot.lane.b32.xlu0 %v1640_v37, %s1383_s12  ;;  %v1646_v46 = vadd.f32 0.01, %v695_v38  ;;  %v124_v31 = vmul.f32 0.3, %v1300_v39  ;;  %v1302_v32 = vpop.eup %1301  ;;  %v309_v38 = vsel %vm277_vm1, %v300_v17, %v1459_v6  ;;  %v279_v39 = vsel %vm277_vm1, %v278_v18, %v1437_v0 }
  0x58   :  { %396 = vrot.lane.b32.xlu1 %v1642_v40, %s1383_s12  ;;  %v1650_v33 = vadd.f32 0.01, %v696_v16  ;;  %v697_v43 = vmul.f32 0.3, %v1302_v32  ;;  %v281_v32 = vsel %vm277_vm1, %v280_v21, %v1450_v3  ;;  %v296_v53 = vrot.slane %v279_v39, 4 }
  0x59   :  { %v1654_v12 = vadd.f32 0.01, %v124_v31  ;;  %v301_v31 = vrot.slane %v289_v23, 4  ;;  %v1767_v23 = vshrl.u32 %v131_v1, 7 }
  0x5a   :  { %v1665_v45 = vadd.f32 0.01, %v697_v43  ;;  %v282_v43 = vrot.slane %v1507_v29, 4  ;;  %v305_v18 = vsel %vm277_vm1, %v296_v53, %v1437_v0 }
  0x5b   :  { %961 = vrot.lane.b32.xlu0 %v1646_v46, %s1384_s30  ;;  %vm138_vm4 = vcmp.lt.s32.totalorder %v1767_v23, 3  ;;  %vm707_vm8 = vcmp.lt.s32.totalorder %v1767_v23, 1 }
  0x5c   :  { %964 = vrot.lane.b32.xlu1 %v1650_v33, %s1384_s30 }
  0x5f   :  { %399 = vrot.lane.b32.xlu0 %v1654_v12, %s1383_s12 }
  0x60   :  { %1088 = vrot.lane.b32.xlu1 %v1661_v44, %s1384_s30 }
  0x63   :  { %967 = vrot.lane.b32.xlu0 %v1665_v45, %s1384_s30 }
  0x64   :  { %207 = vrot.lane.b32.xlu1 %v1450_v3, %s1385_s15 }
  0x67   :  { %205 = vrot.lane.b32.xlu0 %v1437_v0, %s1385_s15 }
  0x68   :  { %213 = vrot.lane.b32.xlu1 %v1459_v6, %s1385_s15 }
  0x6b   :  { %211 = vrot.lane.b32.xlu0 %v1445_v2, %s1385_s15 }
  0x6c   :  { %776 = vrot.lane.b32.xlu1 %v1478_v14, %s1385_s15 }
  0x6f   :  { %774 = vrot.lane.b32.xlu0 %v1465_v9, %s1385_s15 }
  0x70   :  { %782 = vrot.lane.b32.xlu1 %v1494_v20, %s1385_s15 }
  0x73   :  { %780 = vrot.lane.b32.xlu0 %v1483_v15, %s1385_s15 }
  0x74   :  { %215 = vrot.lane.b32.xlu1 %v1512_v30, %s1385_s15 }
  0x77   :  { %209 = vrot.lane.b32.xlu0 %v1507_v29, %s1385_s15 }
  0x78   :  { %219 = vrot.lane.b32.xlu1 %v1527_v36, %s1385_s15 }
  0x7b   :  { %217 = vrot.lane.b32.xlu0 %v1522_v35, %s1385_s15 }
  0x7c   :  { %784 = vrot.lane.b32.xlu1 %v1541_v42, %s1385_s15 }
  0x7f   :  { %778 = vrot.lane.b32.xlu0 %v1536_v41, %s1385_s15 }
  0x8f   :  { %v143_v49 = vpop.permute.xlu0 %142  ;;  %v152_v51 = vpop.permute.xlu1 %151 }
  0x90   :  { %v144_v25 = vsel %vm141_vm0, %v143_v49, %v1437_v0  ;;  %v153_v50 = vsel %vm141_vm0, %v152_v51, %v1445_v2  ;;  %v335_v49 = vsub.f32 %v308_v34, %v317_v24  ;;  %v316_v34 = vrot.slane %v1507_v29, 7 }
  0x91   :  { %169 = vrot.lane.b32.xlu0 %v144_v25, %s1383_s12  ;;  %v336_v25 = vsub.f32 %v309_v38, %v318_v26 }
  0x93   :  { %v146_v54 = vpop.permute.xlu0 %145  ;;  %v155_v56 = vpop.permute.xlu1 %154 }
  0x94   :  { %v147_v55 = vsel %vm141_vm0, %v146_v54, %v1450_v3  ;;  %v156_v4 = vsel %vm141_vm0, %v155_v56, %v1459_v6  ;;  %v283_v56 = vsel %vm277_vm1, %v282_v43, %v1507_v29 }
  0x95   :  { %171 = vrot.lane.b32.xlu1 %v147_v55, %s1383_s12  ;;  %175 = vrot.lane.b32.xlu0 %v153_v50, %s1383_s12  ;;  %v297_v50 = vrot.slane %v281_v32, 4  ;;  %v310_v55 = vsel %vm277_vm1, %v301_v31, %v1512_v30  ;;  %v298_v17 = vrot.slane %v283_v56, 4  ;;  %v1780_v31 = vand.u32 127, %v131_v1 }
  0x96   :  { %v290_v32 = vrot.slane %v1522_v35, 4 }
  0x97   :  { %v712_v5 = vpop.permute.xlu0 %711  ;;  %v715_v10 = vpop.permute.xlu1 %714  ;;  %v307_v39 = vsel %vm277_vm1, %v298_v17, %v1507_v29  ;;  %vm135_vm5 = vcmp.lt.s32.totalorder %v1780_v31, 7  ;;  %vm704_vm7 = vcmp.lt.s32.totalorder %v1780_v31, 3  ;;  %vm1212_vm14 = vcmp.eq.s32.totalorder %v1780_v31, 1 }
  0x98   :  { %v713_v8 = vsel %vm710_vm2, %v712_v5, %v1465_v9  ;;  %v716_v19 = vsel %vm710_vm2, %v715_v10, %v1478_v14  ;;  %v345_v5 = vand.u32 2147483647, %v336_v25  ;;  %v314_v10 = vrot.slane %v1437_v0, 7 }
  0x99   :  { %177 = vrot.lane.b32.xlu1 %v156_v4, %s1383_s12  ;;  %738 = vrot.lane.b32.xlu0 %v713_v8, %s1384_s30  ;;  %v344_v4 = vand.u32 2147483647, %v335_v49  ;;  %vm1209_vm15 = vcmp.eq.s32.totalorder %v1780_v31, 0 }
  0x9a   :  { %v357_v26 = vsel %vm350_vm3, %v345_v5, 0.0  ;;  %v332_v0 = vsub.f32 %v305_v18, %v314_v10  ;;  %v848_v5 = vrot.slane %v1478_v14, 6 }
  0x9b   :  { %v721_v22 = vpop.permute.xlu0 %720  ;;  %v724_v28 = vpop.permute.xlu1 %723  ;;  %v356_v24 = vsel %vm350_vm3, %v344_v4, 0.0  ;;  %v846_v4 = vrot.slane %v1465_v9, 6 }
  0x9c   :  { %v722_v27 = vsel %vm710_vm2, %v721_v22, %v1483_v15  ;;  %v725_v16 = vsel %vm710_vm2, %v724_v28, %v1494_v20 }
  0x9d   :  { %740 = vrot.lane.b32.xlu1 %v716_v19, %s1384_s30  ;;  %744 = vrot.lane.b32.xlu0 %v722_v27, %s1384_s30  ;;  %v306_v19 = vsel %vm277_vm1, %v297_v50, %v1450_v3  ;;  %v852_v50 = vrot.slane %v1483_v15, 6 }
  0x9e   :  { %v333_v38 = vsub.f32 %v306_v19, %v315_v13  ;;  %v856_v19 = vrot.slane %v1541_v42, 6 }
  0x9f   :  { %v149_v2 = vpop.permute.xlu0 %148  ;;  %v158_v51 = vpop.permute.xlu1 %157  ;;  %v853_v17 = vsel %vm845_vm6, %v852_v50, %v1483_v15 }
  0xa0   :  { %v150_v6 = vsel %vm141_vm0, %v149_v2, %v1507_v29  ;;  %v159_v54 = vsel %vm141_vm0, %v158_v51, %v1512_v30  ;;  %v337_v30 = vsub.f32 %v310_v55, %v319_v52  ;;  %v358_v2 = vadd.f32 %v357_v26, %v356_v24 }
  0xa1   :  { %746 = vrot.lane.b32.xlu1 %v725_v16, %s1384_s30  ;;  %173 = vrot.lane.b32.xlu0 %v150_v6, %s1383_s12  ;;  %v334_v6 = vsub.f32 %v307_v39, %v316_v34  ;;  %v341_v51 = vand.u32 2147483647, %v332_v0  ;;  %v342_v52 = vand.u32 2147483647, %v333_v38  ;;  %v292_v29 = vrot.slane %v1527_v36, 4 }
  0xa2   :  { %v346_v3 = vand.u32 2147483647, %v337_v30  ;;  %v850_v24 = vrot.slane %v1536_v41, 6  ;;  %v847_v34 = vsel %vm845_vm6, %v846_v4, %v1465_v9  ;;  %v849_v0 = vsel %vm845_vm6, %v848_v5, %v1478_v14 }
  0xa3   :  { %v161_v57 = vpop.permute.xlu0 %160  ;;  %v164_v8 = vpop.permute.xlu1 %163  ;;  %v351_v10 = vsel %vm350_vm3, %v341_v51, 0.0  ;;  %v352_v13 = vsel %vm350_vm3, %v342_v52, 0.0  ;;  %v867_v39 = vrot.slane %v853_v17, 6  ;;  %v864_v52 = vrot.slane %v847_v34, 6 }
  0xa4   :  { %v162_v7 = vsel %vm141_vm0, %v161_v57, %v1522_v35  ;;  %v165_v21 = vsel %vm141_vm0, %v164_v8, %v1527_v36  ;;  %v359_v53 = vsel %vm350_vm3, %v346_v3, 0.0  ;;  %v1386_v57 = vmov 0.0  }
  0xa5   :  { %179 = vrot.lane.b32.xlu1 %v159_v54, %s1383_s12  ;;  %181 = vrot.lane.b32.xlu0 %v162_v7, %s1383_s12  ;;  %v854_v54 = vrot.slane %v1494_v20, 6  ;;  %v1245_v1 = vsel %vm138_vm4, 1.0, %v1386_v57  ;;  %v360_v7 = vadd.f32 %v359_v53, %v358_v2  ;;  %v343_v8 = vand.u32 2147483647, %v334_v6 }
  0xa6   :  { %v1244_v30 = vsel %vm135_vm5, 1.0, %v1386_v57  ;;  %v860_v2 = vrot.slane %v1570_v61, 6  ;;  %v851_v51 = vsel %vm845_vm6, %v850_v24, %v1536_v41  ;;  %v865_v53 = vrot.slane %v849_v0, 6 }
  0xa7   :  { %v718_v22 = vpop.permute.xlu0 %717  ;;  %v727_v28 = vpop.permute.xlu1 %726  ;;  %v855_v18 = vsel %vm845_vm6, %v854_v54, %v1494_v20  ;;  %v367_v38 = vmul.f32 0.33333334, %v360_v7  ;;  %v354_v3 = vsel %vm350_vm3, %v343_v8, 0.0  ;;  %v1834_v50 = vsel %vm707_vm8, 1.0, %v1386_v57 }
  0xa8   :  { %v719_v27 = vsel %vm710_vm2, %v718_v22, %v1536_v41  ;;  %v728_v16 = vsel %vm710_vm2, %v727_v28, %v1541_v42  ;;  %v1255_v22 = vsel %vm704_vm7, 1.0, %v1386_v57  ;;  %v353_v28 = vadd.f32 %v352_v13, %v351_v10 }
  0xa9   :  { %183 = vrot.lane.b32.xlu1 %v165_v21, %s1383_s12  ;;  %742 = vrot.lane.b32.xlu0 %v719_v27, %s1384_s30  ;;  %v1814_v27 = vrot.slane %v1245_v1, 7  ;;  %v876_v5 = vsel %vm845_vm6, %v867_v39, %v1483_v15  ;;  %v887_v8 = vrot.slane %v1541_v42, 7  ;;  %v866_v10 = vrot.slane %v851_v51, 6 }
  0xaa   :  { %v355_v54 = vadd.f32 %v354_v3, %v353_v28  ;;  %v882_v13 = vrot.slane %v1465_v9, 7  ;;  %v294_v17 = vrot.slane %v1555_v48, 4  ;;  %v431_v24 = vrot.slane %v1642_v40, 4 }
  0xab   :  { %v730_v43 = vpop.permute.xlu0 %729  ;;  %v733_v25 = vpop.permute.xlu1 %732  ;;  %v1839_v1 = vmul.f32 %v1814_v27, %v367_v38  ;;  %v429_v28 = vrot.slane %v1640_v37, 4 }
  0xac   :  { %v731_v49 = vsel %vm710_vm2, %v730_v43, %v1550_v47  ;;  %v734_v55 = vsel %vm710_vm2, %v733_v25, %v1570_v61  ;;  %v858_v43 = vrot.slane %v1550_v47, 6  ;;  %v857_v25 = vsel %vm845_vm6, %v856_v19, %v1541_v42 }
  0xad   :  { %748 = vrot.lane.b32.xlu1 %v728_v16, %s1384_s30  ;;  %750 = vrot.lane.b32.xlu0 %v731_v49, %s1384_s30  ;;  %v868_v16 = vrot.slane %v855_v18, 6  ;;  %v1274_v49 = vpack.i.bf16 %v1255_v22, %v1244_v30  ;;  %v869_v4 = vrot.slane %v857_v25, 6  ;;  %v883_v30 = vrot.slane %v1478_v14, 7 }
  0xae   :  { %v366_v18 = vmul.f32 0.33333334, %v355_v54  ;;  %v291_v22 = vsel %vm277_vm1, %v290_v32, %v1522_v35  ;;  %v875_v32 = vsel %vm845_vm6, %v866_v10, %v1536_v41  ;;  %v862_v54 = vrot.slane %v1575_v62, 6 }
  0xaf   :  { %v167_v56 = vpop.permute.xlu0 %166  ;;  %v736_v26 = vpop.permute.xlu1 %735  ;;  %v877_v7 = vsel %vm845_vm6, %v868_v16, %v1494_v20  ;;  %v302_v3 = vrot.slane %v291_v22, 4 }
  0xb0   :  { %v168_v21 = vsel %vm141_vm0, %v167_v56, %v1555_v48  ;;  %v737_v6 = vsel %vm710_vm2, %v736_v26, %v1575_v62  ;;  %v886_v56 = vrot.slane %v1494_v20, 7  ;;  %v874_v20 = vsel %vm845_vm6, %v865_v53, %v1478_v14 }
  0xb1   :  { %752 = vrot.lane.b32.xlu1 %v734_v55, %s1384_s30  ;;  %786 = vrot.lane.b32.xlu0 %v1550_v47, %s1385_s15  ;;  %v885_v55 = vrot.slane %v1483_v15, 7  ;;  %v873_v15 = vsel %vm845_vm6, %v864_v52, %v1465_v9  ;;  %v878_v26 = vsel %vm845_vm6, %v869_v4, %v1541_v42  ;;  %v884_v9 = vrot.slane %v1536_v41, 7 }
  0xb2   :  { %v293_v14 = vsel %vm277_vm1, %v292_v29, %v1527_v36  ;;  %v900_v34 = vsub.f32 %v873_v15, %v882_v13  ;;  %v901_v0 = vsub.f32 %v874_v20, %v883_v30  ;;  %v295_v29 = vsel %vm277_vm1, %v294_v17, %v1555_v48 }
  0xb3   :  { %v518_v23 = vpop.permute.xlu1 %517  ;;  %v515_v57 = vpop.permute.xlu0 %514  ;;  %v903_v19 = vsub.f32 %v876_v5, %v885_v55  ;;  %v303_v51 = vrot.slane %v293_v14, 4  ;;  %v902_v52 = vsub.f32 %v875_v32, %v884_v9  ;;  %v859_v41 = vsel %vm845_vm6, %v858_v43, %v1550_v47 }
  0xb4   :  { %v516_v42 = vsel %vm141_vm0, %v515_v57, %v1608_v58  ;;  %v519_v38 = vsel %vm141_vm0, %v518_v23, %v1613_v59  ;;  %v861_v53 = vsel %vm845_vm6, %v860_v2, %v1570_v61  ;;  %v909_v55 = vand.u32 2147483647, %v900_v34 }
  0xb5   :  { %788 = vrot.lane.b32.xlu1 %v1570_v61, %s1385_s15  ;;  %185 = vrot.lane.b32.xlu0 %v168_v21, %s1383_s12  ;;  %v904_v21 = vsub.f32 %v877_v7, %v886_v56  ;;  %v912_v25 = vand.u32 2147483647, %v903_v19  ;;  %v910_v56 = vand.u32 2147483647, %v901_v0  ;;  %v304_v4 = vrot.slane %v295_v29, 4 }
  0xb6   :  { %v320_v5 = vrot.slane %v1522_v35, 7  ;;  %v311_v2 = vsel %vm277_vm1, %v302_v3, %v1522_v35  ;;  %v321_v23 = vrot.slane %v1527_v36, 7  ;;  %v870_v10 = vrot.slane %v859_v41, 6 }
  0xb7   :  { %v1086_v39 = vpop.permute.xlu1 %1085  ;;  %v1083_v16 = vpop.permute.xlu0 %1082  ;;  %v871_v13 = vrot.slane %v861_v53, 6  ;;  %v924_v30 = vsel %vm918_vm9, %v912_v25, 0.0  ;;  %v911_v20 = vand.u32 2147483647, %v902_v52  ;;  %v863_v17 = vsel %vm845_vm6, %v862_v54, %v1575_v62 }
  0xb8   :  { %v1084_v7 = vsel %vm710_vm2, %v1083_v16, %v1622_v60  ;;  %v1087_v43 = vsel %vm710_vm2, %v1086_v39, %v1627_v63  ;;  %v919_v35 = vsel %vm918_vm9, %v909_v55, 0.0  ;;  %v920_v19 = vsel %vm918_vm9, %v910_v56, 0.0 }
  0xb9   :  { %754 = vrot.lane.b32.xlu1 %v737_v6, %s1384_s30  ;;  %221 = vrot.lane.b32.xlu0 %v1555_v48, %s1385_s15  ;;  %v913_v6 = vand.u32 2147483647, %v904_v21  ;;  %v338_v21 = vsub.f32 %v311_v2, %v320_v5  ;;  %v313_v22 = vsel %vm277_vm1, %v304_v4, %v1555_v48  ;;  %v888_v9 = vrot.slane %v1550_v47, 7 }
  0xba   :  { %v889_v14 = vrot.slane %v1570_v61, 7  ;;  %v372_v34 = vmul.f32 %v1814_v27, %v366_v18  ;;  %v872_v0 = vrot.slane %v863_v17, 6  ;;  %v432_v29 = vsel %vm277_vm1, %v431_v24, %v1642_v40 }
  0xbb   :  { %v925_v15 = vsel %vm918_vm9, %v913_v6, 0.0  ;;  %v1910_v32 = vpop.permute.xlu1 %520  ;;  %v921_v18 = vadd.f32 %v920_v19, %v919_v35  ;;  %v890_v24 = vrot.slane %v1575_v62, 7  ;;  %v385_v52 = vsub.f32 0.0, %v1839_v1 }
  0xbc   :  { %v926_v3 = vadd.f32 %v925_v15, %v924_v30  ;;  %v436_v41 = vrot.slane %v432_v29, 4  ;;  %v881_v53 = vsel %vm845_vm6, %v872_v0, %v1575_v62  ;;  %v384_v54 = vsub.f32 0.0, %v372_v34 }
  0xbd   :  { %790 = vrot.lane.b32.xlu1 %v1575_v62, %s1385_s15  ;;  %1275 = vrot.lane.b32.xlu0 %v1274_v49, %s1385_s15  ;;  %v905_v49 = vsub.f32 %v878_v26, %v887_v8  ;;  %v312_v8 = vsel %vm277_vm1, %v303_v51, %v1527_v36  ;;  %v322_v36 = vrot.slane %v1555_v48, 7  ;;  %v430_v48 = vsel %vm277_vm1, %v429_v28, %v1640_v37 }
  0xbe   :  { %v339_v26 = vsub.f32 %v312_v8, %v321_v23  ;;  %v1929_v28 = vrot.slane %v1834_v50, 7  ;;  %v552_v55 = vrot.slane %v1613_v59, 4  ;;  %v550_v56 = vrot.slane %v1608_v58, 4 }
  0xbf   :  { %v914_v57 = vand.u32 2147483647, %v905_v49  ;;  %v340_v16 = vsub.f32 %v313_v22, %v322_v36  ;;  %v435_v5 = vrot.slane %v430_v48, 4  ;;  %v908_v2 = vsub.f32 %v881_v53, %v890_v24 }
  0xc0   :  { %v348_v49 = vand.u32 2147483647, %v339_v26  ;;  %v442_v30 = vrot.slane %v1642_v40, 7  ;;  %v441_v15 = vrot.slane %v1640_v37, 7  ;;  %v551_v17 = vsel %vm277_vm1, %v550_v56, %v1608_v58 }
  0xc1   :  { %523 = vrot.lane.b32.xlu1 %v516_v42, %s1383_s12  ;;  %525 = vrot.lane.b32.xlu0 %v519_v38, %s1383_s12  ;;  %v879_v42 = vsel %vm845_vm6, %v870_v10, %v1550_v47  ;;  %v880_v38 = vsel %vm845_vm6, %v871_v13, %v1570_v61  ;;  %v927_v39 = vsel %vm918_vm9, %v914_v57, 0.0  ;;  %v922_v47 = vsel %vm918_vm9, %v911_v20, 0.0 }
  0xc2   :  { %v347_v61 = vand.u32 2147483647, %v338_v21  ;;  %v906_v25 = vsub.f32 %v879_v42, %v888_v9  ;;  %v907_v6 = vsub.f32 %v880_v38, %v889_v14  ;;  %v928_v4 = vadd.f32 %v927_v39, %v926_v3 }
  0xc3   :  { %v923_v1 = vadd.f32 %v922_v47, %v921_v18  ;;  %v362_v62 = vsel %vm350_vm3, %v348_v49, 0.0  ;;  %v389_v10 = vmul.f32 1.442695, %v385_v52  ;;  %v439_v13 = vsel %vm277_vm1, %v436_v41, %v1642_v40 }
  0xc4   :  { %v915_v23 = vand.u32 2147483647, %v906_v25  ;;  %v916_v57 = vand.u32 2147483647, %v907_v6  ;;  %v553_v20 = vsel %vm277_vm1, %v552_v55, %v1613_v59  ;;  %v935_v35 = vmul.f32 0.33333334, %v928_v4 }
  0xc5   :  { %1091 = vrot.lane.b32.xlu1 %v1084_v7, %s1384_s30  ;;  %1093 = vrot.lane.b32.xlu0 %v1087_v43, %s1384_s30  ;;  %v349_v7 = vand.u32 2147483647, %v340_v16  ;;  %v361_v43 = vsel %vm350_vm3, %v347_v61, 0.0  ;;  %v999_v19 = vrot.slane %v1650_v33, 6  ;;  %v387_v36 = vmul.f32 1.442695, %v384_v54 }
  0xc6   :  { %v438_v21 = vsel %vm277_vm1, %v435_v5, %v1640_v37  ;;  %v934_v22 = vmul.f32 0.33333334, %v923_v1  ;;  %v363_v26 = vadd.f32 %v362_v62, %v361_v43  ;;  %v917_v14 = vand.u32 2147483647, %v908_v2 }
  0xc7   :  { %v364_v9 = vsel %vm350_vm3, %v349_v7, 0.0  ;;  %v929_v34 = vsel %vm918_vm9, %v915_v23, 0.0  ;;  %v930_v0 = vsel %vm918_vm9, %v916_v57, 0.0  ;;  %v448_v29 = vsub.f32 %v439_v13, %v442_v30 }
  0xc8   :  { %v557_v48 = vrot.slane %v553_v20, 4  ;;  %v556_v3 = vrot.slane %v551_v17, 4  ;;  %v447_v39 = vsub.f32 %v438_v21, %v441_v15  ;;  %v941_v18 = vmul.f32 %v1929_v28, %v935_v35 }
  0xc9   :  { %414 = vrot.lane.b32.xlu1 %v1640_v37, %s1385_s15  ;;  %416 = vrot.lane.b32.xlu0 %v1642_v40, %s1385_s15  ;;  %v394_v51 = vpop.permute.xlu0 %393  ;;  %v1000_v47 = vsel %vm845_vm6, %v999_v19, %v1650_v33  ;;  %v997_v16 = vrot.slane %v1646_v46, 6  ;;  %1303 = vpow2.f32 %v389_v10  ;;  %v940_v61 = vmul.f32 %v1929_v28, %v934_v22 }
  0xca   :  { %v1940_v50 = vpop.permute.xlu1 %396  ;;  %v365_v49 = vadd.f32 %v364_v9, %v363_v26  ;;  %v931_v24 = vadd.f32 %v930_v0, %v929_v34  ;;  %v522_v25 = vsel %vm141_vm0, %v1910_v32, %v1636_v11  ;;  %v395_v6 = vsel %vm141_vm0, %v394_v51, %v1640_v37 }
  0xcb   :  { %1305 = vpow2.f32 %v387_v36  ;;  %v932_v52 = vsel %vm918_vm9, %v917_v14, 0.0  ;;  %v560_v53 = vsel %vm277_vm1, %v557_v48, %v1613_v59  ;;  %v563_v54 = vrot.slane %v1613_v59, 7 }
  0xcc   :  { %v559_v55 = vsel %vm277_vm1, %v556_v3, %v1608_v58  ;;  %v562_v56 = vrot.slane %v1608_v58, 7  ;;  %v953_v4 = vsub.f32 0.0, %v941_v18  ;;  %v1004_v5 = vrot.slane %v1000_v47, 6 }
  0xcd   :  { %535 = vrot.lane.b32.xlu1 %v1608_v58, %s1385_s15  ;;  %537 = vrot.lane.b32.xlu0 %v1613_v59, %s1385_s15  ;;  %v962_v8 = vpop.permute.xlu0 %961  ;;  %v998_v32 = vsel %vm845_vm6, %v997_v16, %v1646_v46  ;;  %v1120_v51 = vrot.slane %v1627_v63, 6  ;;  %v952_v7 = vsub.f32 0.0, %v940_v61  ;;  %v1118_v59 = vrot.slane %v1622_v60, 6 }
  0xce   :  { %v965_v42 = vpop.permute.xlu1 %964  ;;  %v368_v43 = vmul.f32 0.33333334, %v365_v49  ;;  %v933_v62 = vadd.f32 %v932_v52, %v931_v24  ;;  %v398_v58 = vsel %vm141_vm0, %v1940_v50, %v1642_v40  ;;  %v963_v2 = vsel %vm710_vm2, %v962_v8, %v1646_v46 }
  0xcf   :  { %v451_v23 = vmul.f32 %v448_v29, %v1814_v27  ;;  %v450_v10 = vmul.f32 %v447_v39, %v1814_v27  ;;  %v569_v13 = vsub.f32 %v560_v53, %v563_v54  ;;  %v568_v30 = vsub.f32 %v559_v55, %v562_v56 }
  0xd0   :  { %v1010_v15 = vrot.slane %v1650_v33, 7  ;;  %v957_v20 = vmul.f32 1.442695, %v953_v4  ;;  %v1007_v17 = vsel %vm845_vm6, %v1004_v5, %v1650_v33  ;;  %v1003_v35 = vrot.slane %v998_v32, 6 }
  0xd1   :  { %982 = vrot.lane.b32.xlu1 %v1646_v46, %s1385_s15  ;;  %984 = vrot.lane.b32.xlu0 %v1650_v33, %s1385_s15  ;;  %v400_v38 = vpop.permute.xlu0 %399  ;;  %v1121_v50 = vsel %vm845_vm6, %v1120_v51, %v1627_v63  ;;  %v955_v19 = vmul.f32 1.442695, %v952_v7  ;;  %v1119_v36 = vsel %vm845_vm6, %v1118_v59, %v1622_v60  ;;  %v374_v21 = vmul.f32 %v1814_v27, %v368_v43 }
  0xd2   :  { %v1089_v1 = vpop.permute.xlu1 %1088  ;;  %v936_v22 = vmul.f32 0.33333334, %v933_v62  ;;  %v966_v26 = vsel %vm710_vm2, %v965_v42, %v1650_v33  ;;  %v401_v9 = vsel %vm141_vm0, %v400_v38, %v1654_v12  ;;  %v554_v14 = vrot.slane %v1636_v11, 4 }
  0xd3   :  { %v433_v34 = vrot.slane %v1654_v12, 4  ;;  %v460_v29 = vand.u32 2147483647, %v451_v23  ;;  %v572_v48 = vmul.f32 %v569_v13, %v1814_v27  ;;  %v571_v3 = vmul.f32 %v568_v30, %v1814_v27 }
  0xd4   :  { %v1016_v39 = vsub.f32 %v1007_v17, %v1010_v15  ;;  %1307 = vpow2.f32 %v957_v20  ;;  %v1009_v18 = vrot.slane %v1646_v46, 7  ;;  %v1125_v47 = vrot.slane %v1121_v50, 6 }
  0xd5   :  { %1103 = vrot.lane.b32.xlu1 %v1622_v60, %s1385_s15  ;;  %1105 = vrot.lane.b32.xlu0 %v1627_v63, %s1385_s15  ;;  %v968_v41 = vpop.permute.xlu0 %967  ;;  %v1124_v42 = vrot.slane %v1119_v36, 6  ;;  %1309 = vpow2.f32 %v955_v19  ;;  %v1006_v38 = vsel %vm845_vm6, %v1003_v35, %v1646_v46  ;;  %v386_v16 = vsub.f32 0.0, %v374_v21 }
  0xd6   :  { %v2005_v8 = vpop.permute.xlu1 %207  ;;  %v942_v61 = vmul.f32 %v1929_v28, %v936_v22  ;;  %v1304_v49 = vpop.eup %1303  ;;  %v1090_v24 = vsel %vm710_vm2, %v1089_v1, %v1661_v44  ;;  %v434_v52 = vsel %vm277_vm1, %v433_v34, %v1654_v12  ;;  %v459_v55 = vand.u32 2147483647, %v450_v10 }
  0xd7   :  { %v1131_v56 = vrot.slane %v1627_v63, 7  ;;  %v1122_v4 = vrot.slane %v1661_v44, 6  ;;  %v1001_v5 = vrot.slane %v1665_v45, 6  ;;  %v1015_v32 = vsub.f32 %v1006_v38, %v1009_v18 }
  0xd8   :  { %v1306_v53 = vpop.eup %1305  ;;  %v1127_v51 = vsel %vm845_vm6, %v1124_v42, %v1622_v60  ;;  %v1130_v1 = vrot.slane %v1622_v60, 7  ;;  %v391_v59 = vmul.f32 1.442695, %v386_v16  ;;  %v437_v62 = vrot.slane %v434_v52, 4 }
  0xd9   :  { %527 = vrot.lane.b32.xlu0 %v522_v25, %s1383_s12  ;;  %402 = vrot.lane.b32.xlu1 %v395_v6, %s1383_s12  ;;  %v1995_v57 = vpop.permute.xlu0 %205  ;;  %v969_v25 = vsel %vm710_vm2, %v968_v41, %v1665_v45  ;;  %v555_v6 = vsel %vm277_vm1, %v554_v14, %v1636_v11  ;;  %v1128_v41 = vsel %vm845_vm6, %v1125_v47, %v1627_v63  ;;  %v581_v23 = vand.u32 2147483647, %v572_v48 }
  0xda   :  { %v2034_v54 = vpop.permute.xlu1 %213  ;;  %v558_v43 = vrot.slane %v555_v6, 4  ;;  %v580_v10 = vand.u32 2147483647, %v571_v3  ;;  %v1019_v63 = vmul.f32 %v1016_v39, %v1929_v28  ;;  %v462_v13 = vmul.f32 %v1306_v53, %v459_v55 }
  0xdb   :  { %v1137_v30 = vsub.f32 %v1128_v41, %v1131_v56  ;;  %v1123_v60 = vsel %vm845_vm6, %v1122_v4, %v1661_v44  ;;  %v1002_v15 = vsel %vm845_vm6, %v1001_v5, %v1665_v45  ;;  %v1018_v20 = vmul.f32 %v1015_v32, %v1929_v28 }
  0xdc   :  { %v1136_v17 = vsub.f32 %v1127_v51, %v1130_v1  ;;  %v564_v35 = vrot.slane %v1636_v11, 7  ;;  %v443_v50 = vrot.slane %v1654_v12, 7  ;;  %1311 = vpow2.f32 %v391_v59 }
  0xdd   :  { %404 = vrot.lane.b32.xlu0 %v398_v58, %s1383_s12  ;;  %970 = vrot.lane.b32.xlu1 %v963_v2, %s1384_s30  ;;  %v2016_v0 = vpop.permute.xlu0 %211  ;;  %v954_v58 = vsub.f32 0.0, %v942_v61  ;;  %v463_v2 = vmul.f32 %v1304_v49, %v460_v29  ;;  %v561_v36 = vsel %vm277_vm1, %v558_v43, %v1636_v11  ;;  %v440_v21 = vsel %vm277_vm1, %v437_v62, %v1654_v12 }
  0xde   :  { %v2060_v19 = vpop.permute.xlu1 %776  ;;  %v1005_v14 = vrot.slane %v1002_v15, 6  ;;  %v584_v29 = vmul.f32 %v1304_v49, %v581_v23  ;;  %v583_v48 = vmul.f32 %v1306_v53, %v580_v10  ;;  %v1028_v3 = vand.u32 2147483647, %v1019_v63 }
  0xdf   :  { %v959_v22 = vmul.f32 1.442695, %v954_v58  ;;  %v1140_v39 = vmul.f32 %v1137_v30, %v1929_v28  ;;  %v468_v18 = vrot.slane %v462_v13, 1  ;;  %v1139_v47 = vmul.f32 %v1136_v17, %v1929_v28 }
  0xe0   :  { %v570_v42 = vsub.f32 %v561_v36, %v564_v35  ;;  %v449_v38 = vsub.f32 %v440_v21, %v443_v50  ;;  %v1027_v16 = vand.u32 2147483647, %v1018_v20  ;;  %v1132_v61 = vrot.slane %v1661_v44, 7 }
  0xe1   :  { %972 = vrot.lane.b32.xlu0 %v966_v26, %s1384_s30  ;;  %406 = vrot.lane.b32.xlu1 %v401_v9, %s1383_s12  ;;  %v2046_v7 = vpop.permute.xlu0 %774  ;;  %v469_v26 = vrot.slane %v463_v2, 1  ;;  %v1126_v9 = vrot.slane %v1123_v60, 6  ;;  %1313 = vpow2.f32 %v959_v22  ;;  %v1011_v49 = vrot.slane %v1665_v45, 7 }
  0xe2   :  { %v1008_v6 = vsel %vm845_vm6, %v1005_v14, %v1665_v45  ;;  %v590_v52 = vrot.slane %v584_v29, 1  ;;  %v2080_v53 = vpop.permute.xlu1 %782  ;;  %v1149_v55 = vand.u32 2147483647, %v1140_v39  ;;  %v1148_v4 = vand.u32 2147483647, %v1139_v47 }
  0xe3   :  { %v573_v5 = vmul.f32 %v570_v42, %v1814_v27  ;;  %v452_v32 = vmul.f32 %v449_v38, %v1814_v27  ;;  %v589_v41 = vrot.slane %v583_v48, 1  ;;  %v1017_v59 = vsub.f32 %v1008_v6, %v1011_v49  ;;  %v1329_v47 = vld [vmem:[%s2376_s0] sm:$0xf] }
  0xe4   :  { %vm1220_vm1 = vcmp.eq.s32.totalorder %v1780_v31, 3 }
  0xe5   :  { %1095 = vrot.lane.b32.xlu0 %v1090_v24, %s1384_s30  ;;  %974 = vrot.lane.b32.xlu1 %v969_v25, %s1384_s30  ;;  %v2066_v34 = vpop.permute.xlu0 %780  ;;  %v1129_v25 = vsel %vm845_vm6, %v1126_v9, %v1661_v44  ;;  %v582_v2 = vand.u32 2147483647, %v573_v5  ;;  %v461_v10 = vand.u32 2147483647, %v452_v32  ;;  %v1020_v13 = vmul.f32 %v1017_v59, %v1929_v28  ;;  %v1332_v32 = vld [vmem:[%s2376_s0 + $0x10] sm:$0xf] }
  0xe6   :  { %v1138_v1 = vsub.f32 %v1129_v25, %v1132_v61  ;;  %v2090_v27 = vpop.permute.xlu1 %215  ;;  %v1330_v61 = vld [vmem:[%s2376_s0 + $0x4] sm:$0xf] }
  0xe7   :  { %v1029_v36 = vand.u32 2147483647, %v1020_v13 }
  0xe8   :  { %v1141_v63 = vmul.f32 %v1138_v1, %v1929_v28 }
  0xe9   :  { %539 = vrot.lane.b32.xlu0 %v1636_v11, %s1385_s15  ;;  %418 = vrot.lane.b32.xlu1 %v1654_v12, %s1385_s15  ;;  %v1308_v11 = vpop.eup %1307  ;;  %v2086_v51 = vpop.permute.xlu0 %209 }
  0xea   :  { %v1310_v24 = vpop.eup %1309  ;;  %v1031_v56 = vmul.f32 %v1308_v11, %v1028_v3  ;;  %v1152_v62 = vmul.f32 %v1308_v11, %v1149_v55  ;;  %v1150_v50 = vand.u32 2147483647, %v1141_v63  ;;  %v2098_v22 = vpop.permute.xlu1 %219  ;;  %v1334_v63 = vld [vmem:[%s2377_s1 + $0x2] sm:$0x3] }
  0xeb   :  { %v1151_v58 = vmul.f32 %v1310_v24, %v1148_v4  ;;  %v1312_v30 = vpop.eup %1311 }
  0xec   :  { %v1037_v43 = vrot.slane %v1031_v56, 1  ;;  %v1158_v15 = vrot.slane %v1152_v62, 1  ;;  %v585_v17 = vmul.f32 %v1312_v30, %v582_v2  ;;  %v464_v35 = vmul.f32 %v1312_v30, %v461_v10  ;;  %v1335_v30 = vld [vmem:[%s2377_s1 + $0x6] sm:$0x3] }
  0xed   :  { %1107 = vrot.lane.b32.xlu0 %v1661_v44, %s1385_s15  ;;  %986 = vrot.lane.b32.xlu1 %v1665_v45, %s1385_s15  ;;  %v1030_v44 = vmul.f32 %v1310_v24, %v1027_v16  ;;  %v2094_v60 = vpop.permute.xlu0 %217  ;;  %v1157_v20 = vrot.slane %v1151_v58, 1  ;;  %v1331_v24 = vld [vmem:[%s2376_s0 + $0xc] sm:$0xf] }
  0xee   :  { %v1314_v21 = vpop.eup %1313  ;;  %v470_v9 = vrot.slane %v464_v35, 1  ;;  %v2106_v48 = vpop.permute.xlu1 %784 }
  0xef   :  { %v1036_v23 = vrot.slane %v1030_v44, 1  ;;  %v1153_v14 = vmul.f32 %v1314_v21, %v1150_v50  ;;  %v1032_v29 = vmul.f32 %v1314_v21, %v1029_v36  ;;  %v1333_v44 = vld [vmem:[%s2377_s1] sm:$0x3] }
  0xf1   :  { %473 = vrot.lane.b32.xlu0 %v469_v26, %s1385_s15  ;;  %471 = vrot.lane.b32.xlu1 %v468_v18, %s1385_s15  ;;  %v2102_v28 = vpop.permute.xlu0 %778  ;;  %v591_v26 = vrot.slane %v585_v17, 1  ;;  %v1159_v3 = vrot.slane %v1153_v14, 1  ;;  %v1038_v39 = vrot.slane %v1032_v29, 1  ;;  %v1337_v29 = vld [vmem:[%s2376_s0 + $0x8] sm:$0xf] }
  0xf5   :  { %594 = vrot.lane.b32.xlu0 %v590_v52, %s1385_s15  ;;  %592 = vrot.lane.b32.xlu1 %v589_v41, %s1385_s15 }
  0xf9   :  { %1041 = vrot.lane.b32.xlu0 %v1037_v43, %s1385_s15  ;;  %1039 = vrot.lane.b32.xlu1 %v1036_v23, %s1385_s15 }
  0xfd   :  { %1162 = vrot.lane.b32.xlu0 %v1158_v15, %s1385_s15  ;;  %1160 = vrot.lane.b32.xlu1 %v1157_v20, %s1385_s15 }
 0x101   :  { %596 = vrot.lane.b32.xlu0 %v591_v26, %s1385_s15  ;;  %475 = vrot.lane.b32.xlu1 %v470_v9, %s1385_s15  ;;  %v1336_v9 = vld [vmem:[%s2377_s1 + $0x8] sm:$0x3] }
 0x103   :  { %v170_v18 = vpop.permute.xlu0 %169 }
 0x104   :  { %v187_v42 = vsel %vm141_vm0, %v170_v18, %v1329_v47 }
 0x105   :  { %v232_v38 = vsub.f32 %v187_v42, %v1995_v57  ;;  %1164 = vrot.lane.b32.xlu0 %v1159_v3, %s1385_s15  ;;  %1043 = vrot.lane.b32.xlu1 %v1038_v39, %s1385_s15 }
 0x107   :  { %v172_v11 = vpop.permute.xlu1 %171  ;;  %v176_v16 = vpop.permute.xlu0 %175  ;;  %v241_v6 = vand.u32 2147483647, %v232_v38 }
 0x108   :  { %v188_v49 = vsel %vm141_vm0, %v172_v11, %v1330_v61  ;;  %v190_v25 = vsel %vm141_vm0, %v176_v16, %v1331_v24 }
 0x109   :  { %v233_v57 = vsub.f32 %v188_v49, %v2005_v8  ;;  %v235_v52 = vsub.f32 %v190_v25, %v2016_v0  ;;  %v251_v8 = vsel %vm250_vm10, %v241_v6, 0.0  ;;  %v1338_v49 = vld [vmem:[%s2376_s0 + $0x14] sm:$0xf]  ;;  %v1339_v25 = vld [vmem:[%s2376_s0 + $0x18] sm:$0xf] }
 0x10b   :  { %v242_v55 = vand.u32 2147483647, %v233_v57  ;;  %v178_v56 = vpop.permute.xlu1 %177  ;;  %v739_v4 = vpop.permute.xlu0 %738  ;;  %v244_v5 = vand.u32 2147483647, %v235_v52 }
 0x10c   :  { %v191_v41 = vsel %vm141_vm0, %v178_v56, %v1332_v32  ;;  %v756_v1 = vsel %vm710_vm2, %v739_v4, %v1333_v44 }
 0x10d   :  { %v252_v0 = vsel %vm250_vm10, %v242_v55, 0.0  ;;  %v236_v59 = vsub.f32 %v191_v41, %v2034_v54  ;;  %v801_v43 = vsub.f32 %v756_v1, %v2046_v7  ;;  %v256_v10 = vsel %vm250_vm10, %v244_v5, 0.0  ;;  %v1340_v41 = vld [vmem:[%s2376_s0 + $0x1c] sm:$0xf]  ;;  %v1341_v1 = vld [vmem:[%s2377_s1 + $0x4] sm:$0x3] }
 0x10e   :  { %v253_v62 = vadd.f32 %v252_v0, %v251_v8 }
 0x10f   :  { %v245_v58 = vand.u32 2147483647, %v236_v59  ;;  %v741_v2 = vpop.permute.xlu1 %740  ;;  %v745_v23 = vpop.permute.xlu0 %744  ;;  %v810_v15 = vand.u32 2147483647, %v801_v43 }
 0x110   :  { %v757_v13 = vsel %vm710_vm2, %v741_v2, %v1334_v63  ;;  %v759_v54 = vsel %vm710_vm2, %v745_v23, %v1335_v30 }
 0x111   :  { %v257_v7 = vsel %vm250_vm10, %v245_v58, 0.0  ;;  %v802_v20 = vsub.f32 %v757_v13, %v2060_v19  ;;  %v804_v17 = vsub.f32 %v759_v54, %v2066_v34  ;;  %v820_v34 = vsel %vm819_vm11, %v810_v15, 0.0 }
 0x112   :  { %v258_v35 = vadd.f32 %v257_v7, %v256_v10  ;;  %v1342_v10 = vld [vmem:[%s2377_s1 + $0xa] sm:$0x3] }
 0x113   :  { %v811_v50 = vand.u32 2147483647, %v802_v20  ;;  %v747_v36 = vpop.permute.xlu1 %746  ;;  %v174_v21 = vpop.permute.xlu0 %173  ;;  %v813_v26 = vand.u32 2147483647, %v804_v17 }
 0x114   :  { %v760_v14 = vsel %vm710_vm2, %v747_v36, %v1336_v9  ;;  %v189_v19 = vsel %vm141_vm0, %v174_v21, %v1337_v29 }
 0x115   :  { %v821_v3 = vsel %vm819_vm11, %v811_v50, 0.0  ;;  %v805_v39 = vsub.f32 %v760_v14, %v2080_v53  ;;  %v234_v18 = vsub.f32 %v189_v19, %v2086_v51  ;;  %v825_v61 = vsel %vm819_vm11, %v813_v26, 0.0 }
 0x116   :  { %v822_v47 = vadd.f32 %v821_v3, %v820_v34 }
 0x117   :  { %v814_v42 = vand.u32 2147483647, %v805_v39  ;;  %v243_v38 = vand.u32 2147483647, %v234_v18  ;;  %v180_v11 = vpop.permute.xlu1 %179  ;;  %v182_v16 = vpop.permute.xlu0 %181 }
 0x118   :  { %v192_v24 = vsel %vm141_vm0, %v180_v11, %v1338_v49  ;;  %v193_v53 = vsel %vm141_vm0, %v182_v16, %v1339_v25  ;;  %v1343_v16 = vld [vmem:[%s2376_s0 + $0x20] sm:$0xf] }
 0x119   :  { %v826_v51 = vsel %vm819_vm11, %v814_v42, 0.0  ;;  %v254_v6 = vsel %vm250_vm10, %v243_v38, 0.0  ;;  %v237_v57 = vsub.f32 %v192_v24, %v2090_v27  ;;  %v238_v52 = vsub.f32 %v193_v53, %v2094_v60 }
 0x11a   :  { %v827_v55 = vadd.f32 %v826_v51, %v825_v61  ;;  %v255_v56 = vadd.f32 %v254_v6, %v253_v62 }
 0x11b   :  { %v246_v4 = vand.u32 2147483647, %v237_v57  ;;  %v184_v5 = vpop.permute.xlu1 %183  ;;  %v743_v32 = vpop.permute.xlu0 %742  ;;  %v247_v60 = vand.u32 2147483647, %v238_v52 }
 0x11c   :  { %v194_v44 = vsel %vm141_vm0, %v184_v5, %v1340_v41  ;;  %v758_v8 = vsel %vm710_vm2, %v743_v32, %v1341_v1  ;;  %v267_v6 = vmul.f32 0.33333334, %v255_v56  ;;  %v1344_v32 = vld [vmem:[%s2377_s1 + $0xe] sm:$0x3]  ;;  %v1345_v56 = vld [vmem:[%s2377_s1 + $0xc] sm:$0x3] }
 0x11d   :  { %v259_v27 = vsel %vm250_vm10, %v246_v4, 0.0  ;;  %v239_v0 = vsub.f32 %v194_v44, %v2098_v22  ;;  %v803_v59 = vsub.f32 %v758_v8, %v2102_v28  ;;  %v261_v13 = vsel %vm250_vm10, %v247_v60, 0.0 }
 0x11e   :  { %v260_v43 = vadd.f32 %v259_v27, %v258_v35 }
 0x11f   :  { %v248_v62 = vand.u32 2147483647, %v239_v0  ;;  %v812_v58 = vand.u32 2147483647, %v803_v59  ;;  %v749_v2 = vpop.permute.xlu1 %748  ;;  %v751_v23 = vpop.permute.xlu0 %750  ;;  %v1346_v59 = vld [vmem:[%s2377_s1 + $0x10] sm:$0x3] }
 0x120   :  { %v761_v63 = vsel %vm710_vm2, %v749_v2, %v1342_v10  ;;  %v268_v25 = vmul.f32 0.33333334, %v260_v43  ;;  %v762_v8 = vsel %vm710_vm2, %v751_v23, %v1345_v56 }
 0x121   :  { %v262_v30 = vsel %vm250_vm10, %v248_v62, 0.0  ;;  %v823_v54 = vsel %vm819_vm11, %v812_v58, 0.0  ;;  %v806_v22 = vsub.f32 %v761_v63, %v2106_v48 }
 0x122   :  { %v824_v28 = vadd.f32 %v823_v54, %v822_v47  ;;  %v263_v7 = vadd.f32 %v262_v30, %v261_v13 }
 0x123   :  { %v815_v15 = vand.u32 2147483647, %v806_v22  ;;  %v753_v20 = vpop.permute.xlu1 %752  ;;  %v787_v17 = vpop.permute.xlu0 %786 }
 0x124   :  { %v763_v41 = vsel %vm710_vm2, %v753_v20, %v1344_v32  ;;  %v807_v0 = vsub.f32 %v762_v8, %v787_v17  ;;  %v835_v23 = vmul.f32 0.33333334, %v824_v28 }
 0x125   :  { %v828_v35 = vsel %vm819_vm11, %v815_v15, 0.0 }
 0x126   :  { %v829_v50 = vadd.f32 %v828_v35, %v827_v55  ;;  %v816_v15 = vand.u32 2147483647, %v807_v0 }
 0x127   :  { %v789_v36 = vpop.permute.xlu1 %788  ;;  %v186_v21 = vpop.permute.xlu0 %185 }
 0x128   :  { %v195_v61 = vsel %vm141_vm0, %v186_v21, %v1343_v16  ;;  %v808_v27 = vsub.f32 %v763_v41, %v789_v36  ;;  %v836_v13 = vmul.f32 0.33333334, %v829_v50  ;;  %v830_v50 = vsel %vm819_vm11, %v816_v15, 0.0  ;;  %v1347_v16 = vld [vmem:[%s2378_s2 + $0x4] sm:$0xf] }
 0x12a   :  { %v817_v54 = vand.u32 2147483647, %v808_v27 }
 0x12b   :  { %v755_v26 = vpop.permute.xlu1 %754  ;;  %v222_v9 = vpop.permute.xlu0 %221 }
 0x12c   :  { %v240_v49 = vsub.f32 %v195_v61, %v222_v9  ;;  %v764_v43 = vsel %vm710_vm2, %v755_v26, %v1346_v59 }
 0x12e   :  { %v249_v57 = vand.u32 2147483647, %v240_v49 }
 0x12f   :  { %v791_v14 = vpop.permute.xlu1 %790  ;;  %v1276_v29 = vpop.permute.xlu0 %1275 }
 0x130   :  { %v2216_v24 = vunpack.i.l.bf16 %v1276_v29  ;;  %v264_v44 = vsel %vm250_vm10, %v249_v57, 0.0  ;;  %v2239_v62 = vunpack.i.h.bf16 %v1276_v29  ;;  %v809_v63 = vsub.f32 %v764_v43, %v791_v14  ;;  %v1348_v57 = vld [vmem:[%s2378_s2] sm:$0xf] }
 0x131   :  { %v265_v10 = vadd.f32 %v264_v44, %v263_v7  ;;  %v831_v7 = vsel %vm819_vm11, %v817_v54, 0.0 }
 0x132   :  { %v275_v52 = vmul.f32 %v2216_v24, %v268_v25  ;;  %v274_v55 = vmul.f32 %v2216_v24, %v267_v6  ;;  %v843_v35 = vmul.f32 %v2239_v62, %v836_v13  ;;  %v818_v21 = vand.u32 2147483647, %v809_v63  ;;  %v1350_v13 = vld [vmem:[%s2379_s3 + $0x2] sm:$0x3] }
 0x133   :  { %v2194_v19 = vpop.permute.xlu1 %523  ;;  %v526_v34 = vpop.permute.xlu0 %525  ;;  %v269_v36 = vmul.f32 0.33333334, %v265_v10  ;;  %v842_v26 = vmul.f32 %v2239_v62, %v835_v23  ;;  %v832_v6 = vadd.f32 %v831_v7, %v830_v50  ;;  %v1349_v10 = vld [vmem:[%s2379_s3] sm:$0x3] }
 0x134   :  { %v376_v1 = vsub.f32 0.0, %v275_v52  ;;  %v375_v60 = vsub.f32 0.0, %v274_v55  ;;  %v944_v14 = vsub.f32 0.0, %v843_v35  ;;  %v833_v29 = vsel %vm819_vm11, %v818_v21, 0.0 }
 0x135   :  { %v530_v61 = vsel %vm141_vm0, %v526_v34, %v1347_v16  ;;  %v943_v49 = vsub.f32 0.0, %v842_v26  ;;  %v276_v25 = vmul.f32 %v2216_v24, %v269_v36  ;;  %v529_v52 = vsel %vm141_vm0, %v2194_v19, %v1348_v57 }
 0x136   :  { %v380_v30 = vmul.f32 1.442695, %v376_v1  ;;  %v378_v22 = vmul.f32 1.442695, %v375_v60  ;;  %v834_v41 = vadd.f32 %v833_v29, %v832_v6  ;;  %v948_v34 = vmul.f32 1.442695, %v944_v14 }
 0x137   :  { %v2196_v3 = vpop.permute.xlu1 %1091  ;;  %v2198_v48 = vpop.permute.xlu0 %1093  ;;  %v946_v56 = vmul.f32 1.442695, %v943_v49  ;;  %v377_v8 = vsub.f32 0.0, %v276_v25 }
 0x138   :  { %1315 = vpow2.f32 %v380_v30  ;;  %v837_v0 = vmul.f32 0.33333334, %v834_v41  ;;  %v1097_v63 = vsel %vm710_vm2, %v2196_v3, %v1349_v10  ;;  %v1098_v30 = vsel %vm710_vm2, %v2198_v48, %v1350_v13 }
 0x139   :  { %1317 = vpow2.f32 %v378_v22 }
 0x13a   :  { %1319 = vpow2.f32 %v948_v34  ;;  %v844_v36 = vmul.f32 %v2239_v62, %v837_v0 }
 0x13b   :  { %v2200_v39 = vpop.permute.xlu1 %414  ;;  %v2202_v18 = vpop.permute.xlu0 %416  ;;  %1321 = vpow2.f32 %v946_v56 }
 0x13f   :  { %v2204_v47 = vpop.permute.xlu1 %535  ;;  %v2206_v42 = vpop.permute.xlu0 %537 }
 0x140   :  { %v545_v55 = vsub.f32 %v530_v61, %v2206_v42  ;;  %v544_v32 = vsub.f32 %v529_v52, %v2204_v47  ;;  %v382_v47 = vmul.f32 1.442695, %v377_v8 }
 0x142   :  { %v548_v27 = vmul.f32 %v2216_v24, %v545_v55  ;;  %v547_v60 = vmul.f32 %v2216_v24, %v544_v32  ;;  %1323 = vpow2.f32 %v382_v47 }
 0x143   :  { %v2208_v38 = vpop.permute.xlu1 %982  ;;  %v2210_v11 = vpop.permute.xlu0 %984 }
 0x144   :  { %v575_v42 = vand.u32 2147483647, %v548_v27 }
 0x145   :  { %v2290_v23 = vpop.eup %1315 }
 0x146   :  { %v1318_v22 = vpop.eup %1317 }
 0x147   :  { %v2218_v53 = vpop.permute.xlu1 %1103  ;;  %v2220_v51 = vpop.permute.xlu0 %1105 }
 0x148   :  { %v1113_v54 = vsub.f32 %v1098_v30, %v2220_v51  ;;  %v578_v51 = vmul.f32 %v2290_v23, %v575_v42 }
 0x14a   :  { %v1116_v7 = vmul.f32 %v2239_v62, %v1113_v54 }
 0x14b   :  { %v403_v4 = vpop.permute.xlu1 %402  ;;  %v2224_v5 = vpop.permute.xlu0 %527 }
 0x14c   :  { %v408_v19 = vsel %vm141_vm0, %v403_v4, %v1640_v37  ;;  %v574_v37 = vand.u32 2147483647, %v547_v60  ;;  %v1112_v4 = vsub.f32 %v1097_v63, %v2218_v53  ;;  %v1351_v53 = vld [vmem:[%s2378_s2 + $0x8] sm:$0xf]  ;;  %v1143_v25 = vand.u32 2147483647, %v1116_v7 }
 0x14d   :  { %v423_v15 = vsub.f32 %v408_v19, %v2200_v39  ;;  %v531_v39 = vsel %vm141_vm0, %v2224_v5, %v1351_v53  ;;  %s1387_s2 = smov 127  }
 0x14e   :  { %v1115_v26 = vmul.f32 %v2239_v62, %v1112_v4  ;;  %v577_v14 = vmul.f32 %v1318_v22, %v574_v37 }
 0x14f   :  { %v2241_v58 = vpop.permute.xlu1 %970  ;;  %v2243_v2 = vpop.permute.xlu0 %404 }
 0x150   :  { %v976_v48 = vsel %vm710_vm2, %v2241_v58, %v1646_v46  ;;  %v409_v21 = vsel %vm141_vm0, %v2243_v2, %v1642_v40  ;;  %v426_v46 = vmul.f32 %v2216_v24, %v423_v15  ;;  %v945_v40 = vsub.f32 0.0, %v844_v36 }
 0x151   :  { %v991_v2 = vsub.f32 %v976_v48, %v2208_v38  ;;  %v424_v16 = vsub.f32 %v409_v21, %v2202_v18  ;;  %v1142_v5 = vand.u32 2147483647, %v1115_v26  ;;  %v1320_v18 = vpop.eup %1319 }
 0x152   :  { %v453_v52 = vand.u32 2147483647, %v426_v46  ;;  %v950_v32 = vmul.f32 1.442695, %v945_v40  ;;  %v1146_v27 = vmul.f32 %v1320_v18, %v1143_v25 }
 0x153   :  { %v2245_v20 = vpop.permute.xlu1 %406  ;;  %v2247_v17 = vpop.permute.xlu0 %972  ;;  %v994_v41 = vmul.f32 %v2239_v62, %v991_v2 }
 0x154   :  { %v977_v6 = vsel %vm710_vm2, %v2247_v17, %v1650_v33  ;;  %v410_v33 = vsel %vm141_vm0, %v2245_v20, %v1654_v12  ;;  %v1322_v17 = vpop.eup %1321  ;;  %v456_v0 = vmul.f32 %v1318_v22, %v453_v52  ;;  %1325 = vpow2.f32 %v950_v32  ;;  %v1352_v20 = vld [vmem:[%s2379_s3 + $0x4] sm:$0x3]  ;;  %s2366_s3 = sld [smem:[#allocation5 + $0x1]] }
 0x155   :  { %v992_v34 = vsub.f32 %v977_v6, %v2210_v11  ;;  %v1145_v60 = vmul.f32 %v1322_v17, %v1142_v5  ;;  %v1021_v10 = vand.u32 2147483647, %v994_v41  ;;  %v1324_v30 = vpop.eup %1323  ;;  %vm1216_vm0 = vcmp.eq.s32.totalorder %v1780_v31, 2 }
 0x157   :  { %v2253_v28 = vpop.permute.xlu1 %974  ;;  %v2255_v9 = vpop.permute.xlu0 %1095  ;;  %v995_v37 = vmul.f32 %v2239_v62, %v992_v34 }
 0x158   :  { %v978_v11 = vsel %vm710_vm2, %v2253_v28, %v1665_v45  ;;  %v1024_v28 = vmul.f32 %v1322_v17, %v1021_v10 }
 0x159   :  { %v1022_v53 = vand.u32 2147483647, %v995_v37 }
 0x15b   :  { %v2270_v44 = vpop.permute.xlu1 %418  ;;  %v540_v1 = vpop.permute.xlu0 %539  ;;  %v1025_v26 = vmul.f32 %v1320_v18, %v1022_v53 }
 0x15c   :  { %v546_v50 = vsub.f32 %v531_v39, %v540_v1  ;;  %v427_v1 = vmul.f32 %v2216_v24, %v424_v16  ;;  %v425_v56 = vsub.f32 %v410_v33, %v2270_v44  ;;  %v1099_v44 = vsel %vm710_vm2, %v2255_v9, %v1352_v20 }
 0x15d   :  { %vm1224_vm2 = vcmask 24576  }
 0x15e   :  { %v549_v57 = vmul.f32 %v2216_v24, %v546_v50  ;;  %v454_v42 = vand.u32 2147483647, %v427_v1  ;;  %v428_v12 = vmul.f32 %v2216_v24, %v425_v56 }
 0x15f   :  { %v2274_v59 = vpop.permute.xlu1 %986  ;;  %v2276_v43 = vpop.permute.xlu0 %1107 }
 0x160   :  { %v576_v8 = vand.u32 2147483647, %v549_v57  ;;  %v993_v4 = vsub.f32 %v978_v11, %v2274_v59  ;;  %v1114_v54 = vsub.f32 %v1099_v44, %v2276_v43  ;;  %v457_v45 = vmul.f32 %v2290_v23, %v454_v42 }
 0x161   :  { %v455_v48 = vand.u32 2147483647, %v428_v12  ;;  %v1326_v23 = vpop.eup %1325 }
 0x162   :  { %v579_v24 = vmul.f32 %v1324_v30, %v576_v8  ;;  %v996_v21 = vmul.f32 %v2239_v62, %v993_v4  ;;  %v1117_v9 = vmul.f32 %v2239_v62, %v1114_v54 }
 0x163   :  { %v2295_v35 = vpop.permute.xlu0 %473  ;;  %v472_v3 = vpop.permute.xlu1 %471  ;;  %v458_v7 = vmul.f32 %v1324_v30, %v455_v48 }
 0x164   :  { %v480_v15 = vadd.f32 %v472_v3, %v456_v0  ;;  %v481_v43 = vadd.f32 %v2295_v35, %v457_v45  ;;  %v1144_v3 = vand.u32 2147483647, %v1117_v9 }
 0x167   :  { %v595_v58 = vpop.permute.xlu0 %594  ;;  %v593_v29 = vpop.permute.xlu1 %592 }
 0x168   :  { %v602_v61 = vadd.f32 %v595_v58, %v578_v51  ;;  %v601_v49 = vadd.f32 %v593_v29, %v577_v14  ;;  %v1023_v51 = vand.u32 2147483647, %v996_v21  ;;  %v1147_v58 = vmul.f32 %v1326_v23, %v1144_v3 }
 0x16a   :  { %609 = vrot.lane.b32.xlu0 %v602_v61, %s1387_s2  ;;  %607 = vrot.lane.b32.xlu1 %v601_v49, %s1387_s2  ;;  %v1026_v29 = vmul.f32 %v1326_v23, %v1023_v51 }
 0x16b   :  { %v1042_v55 = vpop.permute.xlu0 %1041  ;;  %v1040_v38 = vpop.permute.xlu1 %1039 }
 0x16c   :  { %v1048_v39 = vadd.f32 %v1040_v38, %v1024_v28  ;;  %v1049_v50 = vadd.f32 %v1042_v55, %v1025_v26 }
 0x16f   :  { %v1163_v19 = vpop.permute.xlu0 %1162  ;;  %v1161_v47 = vpop.permute.xlu1 %1160 }
 0x170   :  { %v1170_v63 = vadd.f32 %v1163_v19, %v1146_v27  ;;  %v1169_v13 = vadd.f32 %v1161_v47, %v1145_v60 }
 0x172   :  { %1177 = vrot.lane.b32.xlu0 %v1170_v63, %s1387_s2  ;;  %1175 = vrot.lane.b32.xlu1 %v1169_v13, %s1387_s2 }
 0x173   :  { %v597_v22 = vpop.permute.xlu0 %596  ;;  %v476_v59 = vpop.permute.xlu1 %475 }
 0x174   :  { %v603_v36 = vadd.f32 %v597_v22, %v579_v24  ;;  %v482_v62 = vadd.f32 %v476_v59, %v458_v7  ;;  %v1203_v24 = vstv %s2366_s3 }
 0x175   :  { %1327 = vrcp.f32 %v1203_v24 }
 0x176   :  { %611 = vrot.lane.b32.xlu0 %v603_v36, %s1387_s2  ;;  %486 = vrot.lane.b32.xlu1 %v480_v15, %s1387_s2 }
 0x177   :  { %v1165_v14 = vpop.permute.xlu0 %1164  ;;  %v1044_v46 = vpop.permute.xlu1 %1043 }
 0x178   :  { %v1171_v35 = vadd.f32 %v1165_v14, %v1147_v58  ;;  %v1050_v40 = vadd.f32 %v1044_v46, %v1026_v29 }
 0x17a   :  { %488 = vrot.lane.b32.xlu0 %v481_v43, %s1387_s2  ;;  %1054 = vrot.lane.b32.xlu1 %v1048_v39, %s1387_s2 }
 0x17e   :  { %1056 = vrot.lane.b32.xlu0 %v1049_v50, %s1387_s2  ;;  %490 = vrot.lane.b32.xlu1 %v482_v62, %s1387_s2 }
 0x182   :  { %1179 = vrot.lane.b32.xlu0 %v1171_v35, %s1387_s2  ;;  %1058 = vrot.lane.b32.xlu1 %v1050_v40, %s1387_s2  ;;  %v1328_v35 = vpop.eup %1327  ;;  %v1213_v40 = vstv %s52_s16 }
 0x1dc   :  { %v610_v2 = vpop.permute.xlu0 %609  ;;  %v608_v16 = vpop.permute.xlu1 %607 }
 0x1dd   :  { %v617_v5 = vsel %vm495_vm12, %v610_v2, 0.0  ;;  %v616_v25 = vsel %vm495_vm12, %v608_v16, 0.0  ;;  %v1214_v2 = vsel %vm1212_vm14, %v1213_v40, 0.0 }
 0x1de   :  { %v618_v6 = vadd.f32 %v617_v5, %v616_v25 }
 0x1e4   :  { %v1178_v61 = vpop.permute.xlu0 %1177  ;;  %v1176_v49 = vpop.permute.xlu1 %1175 }
 0x1e5   :  { %v1185_v56 = vsel %vm1063_vm13, %v1178_v61, 0.0  ;;  %v1184_v8 = vsel %vm1063_vm13, %v1176_v49, 0.0 }
 0x1e6   :  { %v1186_v47 = vadd.f32 %v1185_v56, %v1184_v8 }
 0x1e8   :  { %v612_v57 = vpop.permute.xlu0 %611  ;;  %v487_v52 = vpop.permute.xlu1 %486 }
 0x1e9   :  { %v619_v55 = vsel %vm495_vm12, %v612_v57, 0.0  ;;  %v496_v1 = vsel %vm495_vm12, %v487_v52, 0.0 }
 0x1ea   :  { %v620_v38 = vadd.f32 %v619_v55, %v618_v6  ;;  %v1222_v6 = vsel %vm1220_vm1, %v1203_v24, 0.0 }
 0x1ec   :  { %v489_v32 = vpop.permute.xlu0 %488  ;;  %621 = vadd.xlane.f32.xlu0 %v620_v38  ;;  %v1055_v18 = vpop.permute.xlu1 %1054 }
 0x1ed   :  { %v497_v41 = vsel %vm495_vm12, %v489_v32, 0.0  ;;  %v1064_v19 = vsel %vm1063_vm13, %v1055_v18, 0.0 }
 0x1ee   :  { %v498_v33 = vadd.f32 %v497_v41, %v496_v1 }
 0x1f0   :  { %v1057_v17 = vpop.permute.xlu0 %1056  ;;  %v491_v34 = vpop.permute.xlu1 %490 }
 0x1f1   :  { %v1065_v27 = vsel %vm1063_vm13, %v1057_v17, 0.0  ;;  %v499_v60 = vsel %vm495_vm12, %v491_v34, 0.0 }
 0x1f2   :  { %v500_v0 = vadd.f32 %v499_v60, %v498_v33  ;;  %v1066_v42 = vadd.f32 %v1065_v27, %v1064_v19 }
 0x1f4   :  { %v1180_v10 = vpop.permute.xlu0 %1179  ;;  %501 = vadd.xlane.f32.xlu1 %v500_v0  ;;  %v1059_v63 = vpop.permute.xlu1 %1058 }
 0x1f5   :  { %v1187_v13 = vsel %vm1063_vm13, %v1180_v10, 0.0  ;;  %v1067_v30 = vsel %vm1063_vm13, %v1059_v63, 0.0 }
 0x1f6   :  { %v1188_v37 = vadd.f32 %v1187_v13, %v1186_v47  ;;  %v1068_v12 = vadd.f32 %v1067_v30, %v1066_v42 }
 0x1f8   :  { %1189 = vadd.xlane.f32.xlu1 %v1188_v37  ;;  %1069 = vadd.xlane.f32.xlu0 %v1068_v12 }
 0x275   :  { %v622_v11 = vpop.xlane.xlu0 %621 }
 0x276   :  { %v623_v20 = vrot.slane %v622_v11, 4 }
 0x278   :  { %v624_v44 = vadd.f32 %v623_v20, %v622_v11 }
 0x27a   :  { %v625_v4 = vrot.slane %v624_v44, 2 }
 0x27c   :  { %v626_v28 = vadd.f32 %v625_v4, %v624_v44 }
 0x27d   :  { %v502_v54 = vpop.xlane.xlu1 %501 }
 0x27e   :  { %v503_v22 = vrot.slane %v502_v54, 4  ;;  %v627_v39 = vrot.slane %v626_v28, 1 }
 0x280   :  { %v504_v15 = vadd.f32 %v503_v22, %v502_v54  ;;  %v628_v62 = vadd.f32 %v627_v39, %v626_v28 }
 0x281   :  { %v1070_v36 = vpop.xlane.xlu0 %1069  ;;  %v1190_v45 = vpop.xlane.xlu1 %1189 }
 0x282   :  { %v505_v48 = vrot.slane %v504_v15, 2  ;;  %v1071_v21 = vrot.slane %v1070_v36, 4  ;;  %v1191_v9 = vrot.slane %v1190_v45, 4 }
 0x284   :  { %v1072_v53 = vadd.f32 %v1071_v21, %v1070_v36  ;;  %v1192_v59 = vadd.f32 %v1191_v9, %v1190_v45  ;;  %v506_v43 = vadd.f32 %v505_v48, %v504_v15 }
 0x286   :  { %v1073_v51 = vrot.slane %v1072_v53, 2  ;;  %v1193_v3 = vrot.slane %v1192_v59, 2  ;;  %v507_v26 = vrot.slane %v506_v43, 1 }
 0x288   :  { %v1074_v7 = vadd.f32 %v1073_v51, %v1072_v53  ;;  %v1194_v23 = vadd.f32 %v1193_v3, %v1192_v59  ;;  %v508_v50 = vadd.f32 %v507_v26, %v506_v43 }
 0x28a   :  { %1257 = vpush %v508_v50  ;;  %v1075_v14 = vrot.slane %v1074_v7, 1  ;;  %v1195_v46 = vrot.slane %v1194_v23, 1 }
 0x28b   :  { %1259 = vpush %v628_v62 }
 0x28c   :  { %v1076_v58 = vadd.f32 %v1075_v14, %v1074_v7  ;;  %v1196_v29 = vadd.f32 %v1195_v46, %v1194_v23 }
 0x28e   :  { %1261 = vpush %v1076_v58 }
 0x28f   :  { %1263 = vpush %v1196_v29 }
 0x290   :  { %1265 = vpush %v1328_v35 }
 0x2bb   :  { %s1258_s6 = spop %1257 }
 0x2bc   :  { %s1260_s10 = spop %1259  ;;  %s512_s11 = smul.f32 0.010416667, %s1258_s6 }
 0x2bd   :  { %s632_s13 = smul.f32 0.010416667, %s1260_s10 }
 0x2bf   :  { %s1262_s14 = spop %1261  ;;  %s633_s17 = sadd.f32 %s632_s13, %s512_s11 }
 0x2c0   :  { %s1080_s15 = smul.f32 0.041666668, %s1262_s14  ;;  %s1264_s12 = spop %1263 }
 0x2c1   :  { %s1200_s30 = smul.f32 0.041666668, %s1264_s12  ;;  %s1266_s18 = spop %1265 }
 0x2c3   :  { %s1201_s0 = sadd.f32 %s1200_s30, %s1080_s15 }
 0x2c5   :  { %s1202_s19 = sadd.f32 %s1201_s0, %s633_s17 }
 0x2c7   :  { %s1206_s20 = smul.f32 %s1266_s18, %s1202_s19 }
 0x2c9   :  { %s1207_s21 = smul.f32 0.5, %s1206_s20  ;;  %v1217_v61 = vstv %s1206_s20 }
 0x2ca   :  { %v1218_v25 = vsel %vm1216_vm0, %v1217_v61, 0.0 }
 0x2cb   :  { %s1208_s22 = sadd.f32 %s1207_s21, %s52_s16 }
 0x2cd   :  { %v1210_v16 = vstv %s1208_s22 }
 0x2ce   :  { %v1211_v49 = vsel %vm1209_vm15, %v1210_v16, 0.0 }
 0x2cf   :  { %v1215_v5 = vadd.f32 %v1214_v2, %v1211_v49 }
 0x2d1   :  { %v1219_v57 = vadd.f32 %v1218_v25, %v1215_v5 }
 0x2d3   :  { %v1223_v52 = vadd.f32 %v1222_v6, %v1219_v57 }
 0x2d5   :  { %1225 = vst.msk [vmem:[%s2383_s7] sm:$0x1] %vm1224_vm2, %v1223_v52 }
 0x2d6   :  { %1230 = vsyncpa [#allocation4], 1 }
 0x2d7   :  { %1231 = vsyncpa [#allocation6], 1 }

</bundles_post_ra>
